<compile_context>
chip_gen: v6e
topology: v6e:2x2x1
jax: 0.10.0
libtpu: 0.0.40
codegen_flags: <defaults>
</compile_context>

<pallas_src>
import functools

import numpy as np
import jax
import jax.numpy as jnp
from jax import lax
from jax.experimental import pallas as pl
from jax.experimental.pallas import tpu as pltpu


# ----------------------------------------------------------------------------
# Small host-side helpers
# ----------------------------------------------------------------------------
def _round_up(x, m):
    return -(-int(x) // int(m)) * int(m)


def _tpu_kind():
    try:
        return jax.devices()[0].device_kind.lower()
    except Exception:
        return ""


def _default_use_bf16():
    # bf16 matmul operands (f32 accumulate) on v6e / v7x.  v5e's VPU/EUP are
    # f32-only and unknown backends stay f32 for exactness.
    kind = _tpu_kind()
    return ("v6" in kind) or ("v7" in kind) or ("7x" in kind)


def _vmem_budget_bytes():
    cap = None
    try:
        cap = getattr(pltpu.get_tpu_info(), "vmem_capacity_bytes", None)
    except Exception:
        cap = None
    if not cap or cap <= 0:
        kind = _tpu_kind()
        cap = (64 << 20) if ("v7" in kind or "7x" in kind) else (128 << 20)
    cap = min(int(cap), 128 << 20)
    return int(cap) * 3 // 4          # leave headroom under the physical ceiling


# ----------------------------------------------------------------------------
# Pallas kernel: one grid step = one time chunk through all RNN layers.
# ----------------------------------------------------------------------------
def _rnn_kernel(lengths_ref, emb_ref, *rest,
                num_layers, time_chunk, batch_pad, pad_value, compute_dtype):
    """
    2-D time-major layout: row index = t * BP + b (BP = batch padded to 8 sublanes).

      lengths_ref : (BP, 1)            int32  per-row sequence length (0 for pad rows)
      emb_ref     : (TC*BP, E_pad)     f32    embedded inputs for this time chunk
      weights     : per layer  wih (D_in_pad, H_pad), whh (H_pad, H_pad)  [bf16 or f32]
                               b   (1, H_pad)                              [f32]
      out_ref     : (TC*BP, H_pad)     f32    output block, also the in-place
                                              inter-layer activation buffer
      h_ref       : (L, BP, H_pad)     f32    persistent per-layer hidden state,
                                              carried across grid steps (time chunks)
    """
    weight_refs = rest[:3 * num_layers]
    out_ref = rest[3 * num_layers]
    h_ref = rest[3 * num_layers + 1]

    TC = time_chunk
    BP = batch_pad
    H_pad = out_ref.shape[-1]
    chunk = pl.program_id(0)
    # Full unroll for tiny chunks; cap unroll when H is large to limit vreg pressure.
    unroll = True if TC <= 8 else (8 if H_pad <= 128 else 2)

    # h0 = 0 (nn.RNN default) at the first chunk; carried across chunks afterwards.
    @pl.when(chunk == 0)
    def _():
        h_ref[...] = jnp.zeros_like(h_ref)

    lengths = lengths_ref[...]                       # (BP, 1) int32, hoisted
    t_base = chunk * TC

    for layer in range(num_layers):
        wih_ref, whh_ref, b_ref = weight_refs[3 * layer: 3 * layer + 3]

        # Hoisted per layer/chunk: weight loads (bf16 on v6e/v7x) + f32 bias.
        w_ih = wih_ref[...]                          # (D_in_pad, H_pad)
        w_hh = whh_ref[...]                          # (H_pad, H_pad)
        bias = b_ref[...]                            # (1, H_pad) f32

        # --- Input projection: ONE (TC*BP, D_in)@(D_in, H) MXU matmul per layer
        # per chunk, hoisted out of the serial h->h recurrence. Layers > 0 run
        # in place on the output block (no inter-layer scratch).
        x = emb_ref[...] if layer == 0 else out_ref[...]
        x = x.astype(compute_dtype)
        out_ref[...] = (jnp.dot(x, w_ih, preferred_element_type=jnp.float32)
                        + bias)

        # --- Serial recurrence (the only true critical path): tanh(pre + h@Whh).
        is_last = layer == num_layers - 1

        def step(t, h, w_hh=w_hh, is_last=is_last):
            i = pl.multiple_of(t * BP, 8)            # aligned row window
            pre = out_ref[pl.ds(i, BP), :]           # (BP, H_pad) f32
            h_new = jnp.tanh(pre + jnp.dot(h.astype(compute_dtype), w_hh,
                                           preferred_element_type=jnp.float32))
            if is_last:
                # pad_packed_sequence: timesteps >= lengths[b] -> padding_value,
                # fused into the store (no epilogue masking pass).
                valid = (t_base + t) < lengths       # (BP, 1)
                out_ref[pl.ds(i, BP), :] = jnp.where(valid, h_new,
                                                     jnp.float32(pad_value))
            else:
                out_ref[pl.ds(i, BP), :] = h_new
            return h_new

        h_ref[layer] = lax.fori_loop(0, TC, step, h_ref[layer], unroll=unroll)


# ----------------------------------------------------------------------------
# Wrapper (embedding gather, lane/sublane padding, pallas_call plumbing)
# ----------------------------------------------------------------------------
def rnn_next_loc_predictor(src, lengths, params, padding_value,
                           time_chunk=None, use_bf16=None):
    """Forward of RNNNextLocPredictor: embedding -> packed tanh-RNN -> pad_packed.
    Returns (B, max(lengths), H) float32."""
    emb_table = params["embedding"]                      # (V, E)
    rnn_params = params["rnn"]                           # [(wih, whh, b), ...]
    num_layers = len(rnn_params)
    E = emb_table.shape[1]
    H = rnn_params[0][1].shape[0]

    if use_bf16 is None:
        use_bf16 = _default_use_bf16()
    compute_dtype = jnp.bfloat16 if use_bf16 else jnp.float32

    lengths_list = [int(l) for l in lengths]             # List[int] per module spec
    B = src.shape[0]
    t_out = max(lengths_list)                            # pad_packed output length
    # TODO(synk): bucket t_out (round up to a small set of sizes) in serving to
    # avoid a recompile per distinct max(lengths).

    BP = _round_up(B, 8)                                 # batch -> 8 sublanes
    E_pad = _round_up(E, 128)                            # lane-dense emb / contraction
    H_pad = _round_up(H, 128)                            # lane-dense output stores

    # --- VMEM-budget-derived time chunk --------------------------------------
    w_bytes = 0
    d_in_pad = E_pad
    for _ in range(num_layers):
        w_bytes += (d_in_pad * H_pad + H_pad * H_pad) * (2 if use_bf16 else 4)
        w_bytes += H_pad * 4                             # bias (f32)
        d_in_pad = H_pad
    vmem_limit = _vmem_budget_bytes()
    fixed = 2 * w_bytes + 2 * BP * 4 + num_layers * BP * H_pad * 4
    per_tc = 2 * BP * (E_pad + H_pad) * 4                # double-buffered emb+out rows
    if time_chunk is not None:
        TC = int(time_chunk)
    else:
        TC = (vmem_limit * 3 // 4 - fixed) // per_tc     # fill ~75% of the budget
        TC = min(TC, 512)                                # code-size / compile sanity
    TC = max(1, min(TC, t_out))
    n_chunks = -(-t_out // TC)
    T_pad = n_chunks * TC

    # --- Embedding gather in 2-D time-major layout (row = t*BP + b) ----------
    # (Padded rows/positions gather token 0 and run the recurrence; harmless, as
    #  lengths=0 masks them and they are sliced off below.)
    emb_f32 = emb_table.astype(jnp.float32)
    if E_pad != E:
        emb_f32 = jnp.pad(emb_f32, ((0, 0), (0, E_pad - E)))
    src_tm = jnp.transpose(src[:, :t_out].astype(jnp.int32), (1, 0))     # (t_out, B)
    src_tm = jnp.pad(src_tm, ((0, T_pad - t_out), (0, BP - B)))          # (T_pad, BP)
    emb_2d = jnp.take(emb_f32, src_tm.reshape(-1), axis=0)               # (T_pad*BP, E_pad)
    # TODO(synk): on v5e, move this gather into the kernel (scalar-prefetch ids +
    # VMEM-resident table) to cut streamed HBM bytes.

    lengths_arr = jnp.zeros((BP, 1), jnp.int32).at[:B, 0].set(
        jnp.asarray(lengths_list, dtype=jnp.int32))

    # Weights: zero-padded to lane-dense shapes; matmul operands in compute_dtype
    # (bf16 on v6e/v7x), bias kept f32 (added after f32 accumulation).
    flat_weights = []
    d_in, d_in_pad = E, E_pad
    for (wih, whh, b) in rnn_params:
        wih_p = jnp.zeros((d_in_pad, H_pad), compute_dtype).at[:d_in, :H].set(
            wih.astype(compute_dtype))
        whh_p = jnp.zeros((H_pad, H_pad), compute_dtype).at[:H, :H].set(
            whh.astype(compute_dtype))
        b_p = jnp.zeros((1, H_pad), jnp.float32).at[:, :H].set(
            b.astype(jnp.float32))
        flat_weights.extend([wih_p, whh_p, b_p])
        d_in, d_in_pad = H, H_pad

    kernel = functools.partial(
        _rnn_kernel, num_layers=num_layers, time_chunk=TC, batch_pad=BP,
        pad_value=float(padding_value), compute_dtype=compute_dtype)

    in_specs = [
        pl.BlockSpec((BP, 1), lambda i: (0, 0)),                   # lengths (whole)
        pl.BlockSpec((TC * BP, E_pad), lambda i: (i, 0)),          # emb time chunk
    ]
    for w in flat_weights:                                         # weights (whole)
        in_specs.append(pl.BlockSpec(w.shape, lambda i: (0, 0)))
    out_spec = pl.BlockSpec((TC * BP, H_pad), lambda i: (i, 0))

    # Advisory cost estimate.
    flops = 0
    d = E_pad
    for _ in range(num_layers):
        flops += 2 * T_pad * BP * d * H_pad + 2 * T_pad * BP * H_pad * H_pad
        d = H_pad
    transcendentals = num_layers * T_pad * BP * H_pad
    bytes_accessed = 4 * T_pad * BP * (E_pad + H_pad) + w_bytes + 4 * BP

    out_2d = pl.pallas_call(
        kernel,
        out_shape=jax.ShapeDtypeStruct((T_pad * BP, H_pad), jnp.float32),
        grid_spec=pltpu.PrefetchScalarGridSpec(
            num_scalar_prefetch=0,
            grid=(n_chunks,),
            in_specs=in_specs,
            out_specs=out_spec,
            scratch_shapes=[pltpu.VMEM((num_layers, BP, H_pad), jnp.float32)],
        ),
        compiler_params=pltpu.CompilerParams(
            dimension_semantics=("arbitrary",),    # hidden state carried across chunks
            vmem_limit_bytes=int(vmem_limit)),
        cost_estimate=pl.CostEstimate(flops=int(flops),
                                      transcendentals=int(transcendentals),
                                      bytes_accessed=int(bytes_accessed)),
    )(lengths_arr, emb_2d, *flat_weights)

    # Drop time / batch / lane padding and return batch-major (B, t_out, H).
    out = out_2d.reshape(T_pad, BP, H_pad)[:t_out, :B, :H]
    return jnp.transpose(out, (1, 0, 2))


# ----------------------------------------------------------------------------
# Deterministic parameter init (matches nn.Embedding / nn.RNN shapes).
# Weights stored transposed ((D_in,H)/(H,H)) with combined bias (b_ih + b_hh),
# mathematically identical to PyTorch's h_t = tanh(x W_ih^T + b_ih + h W_hh^T + b_hh).
# NOTE: self.out_linear is defined in __init__ but never used in forward(),
# so it is intentionally not instantiated here.
# ----------------------------------------------------------------------------
def init_params(key, vocab, emb_dim, hidden, num_layers):
    keys = jax.random.split(key, 1 + 4 * num_layers)
    emb = jax.random.normal(keys[0], (vocab, emb_dim), jnp.float32) * 0.1
    rnn = []
    bound = 1.0 / np.sqrt(hidden)
    for layer in range(num_layers):
        d_in = emb_dim if layer == 0 else hidden
        kw = keys[1 + 4 * layer: 1 + 4 * layer + 4]
        wih = jax.random.uniform(kw[0], (d_in, hidden), jnp.float32, -bound, bound)
        whh = jax.random.uniform(kw[1], (hidden, hidden), jnp.float32, -bound, bound)
        bih = jax.random.uniform(kw[2], (1, hidden), jnp.float32, -bound, bound)
        bhh = jax.random.uniform(kw[3], (1, hidden), jnp.float32, -bound, bound)
        rnn.append((wih, whh, bih + bhh))
    return {"embedding": emb, "rnn": rnn}


# ----------------------------------------------------------------------------
# Pure-JAX reference (for correctness check)
# ----------------------------------------------------------------------------
def reference_forward(src, lengths, params, padding_value):
    emb = jnp.take(params["embedding"], src, axis=0)
    t_out = int(max(lengths))
    x = emb[:, :t_out, :].astype(jnp.float32)
    for (wih, whh, b) in params["rnn"]:
        B = x.shape[0]
        h = jnp.zeros((B, wih.shape[1]), jnp.float32)
        outs = []
        for t in range(t_out):
            h = jnp.tanh(x[:, t, :] @ wih + h @ whh + b)
            outs.append(h)
        x = jnp.stack(outs, axis=1)
    mask = jnp.arange(t_out)[None, :] < jnp.asarray(lengths)[:, None]
    return jnp.where(mask[:, :, None], x, jnp.float32(padding_value))


if __name__ == "__main__":
    B, T, E, H = 4, 8, 32, 32
    vocab = 50
    num_layers = 2
    padding_value = -7           # module's self._pad, used by pad_packed_sequence

    key = jax.random.PRNGKey(0)
    k_param, k_src = jax.random.split(key)
    params = init_params(k_param, vocab, E, H, num_layers)
    src = jax.random.randint(k_src, (B, T), 0, vocab, dtype=jnp.int32)
    lengths = [8, 5, 3, 6]

    ref = reference_forward(src, lengths, params, padding_value)

    # Multi-chunk grid (exercises cross-chunk hidden-state carry), pure f32.
    out = rnn_next_loc_predictor(src, lengths, params, padding_value,
                                 time_chunk=4, use_bf16=False)
    out = jax.block_until_ready(out)
    np.testing.assert_allclose(np.asarray(out), np.asarray(ref), rtol=1e-3, atol=1e-3)
    assert out.shape == (B, max(lengths), H)

    # Defaults: VMEM-derived chunk, bf16 matmul operands on v6e/v7x.
    out2 = rnn_next_loc_predictor(src, lengths, params, padding_value)
    out2 = jax.block_until_ready(out2)
    np.testing.assert_allclose(np.asarray(out2), np.asarray(ref), rtol=2e-2, atol=2e-2)

    print("KERNEL_OK")
</pallas_src>

<mosaic_0001>
module attributes {stable_mosaic.version = 11 : i64} {
  func.func @_rnn_kernel(%arg0: i32, %arg1: memref<8x1xi32, #tpu.memory_space<vmem>>, %arg2: memref<32x128xf32, #tpu.memory_space<vmem>>, %arg3: memref<128x128xf32, #tpu.memory_space<vmem>>, %arg4: memref<128x128xf32, #tpu.memory_space<vmem>>, %arg5: memref<1x128xf32, #tpu.memory_space<vmem>>, %arg6: memref<128x128xf32, #tpu.memory_space<vmem>>, %arg7: memref<128x128xf32, #tpu.memory_space<vmem>>, %arg8: memref<1x128xf32, #tpu.memory_space<vmem>>, %arg9: memref<32x128xf32, #tpu.memory_space<vmem>>, %arg10: memref<2x8x128xf32, #tpu.memory_space<vmem>>) attributes {dimension_semantics = [#tpu.dimension_semantics<arbitrary>], iteration_bounds = array<i64: 2>, scalar_prefetch = 0 : i64, scratch_operands = 1 : i64, tpu.core_type = #tpu.core_type<tc>, window_params = [{pipeline_mode = #tpu.pipeline_mode<synchronous>, transform_indices = @transform_0, window_bounds = array<i64: 8, 1>}, {transform_indices = @transform_1, window_bounds = array<i64: 32, 128>}, {pipeline_mode = #tpu.pipeline_mode<synchronous>, transform_indices = @transform_2, window_bounds = array<i64: 128, 128>}, {pipeline_mode = #tpu.pipeline_mode<synchronous>, transform_indices = @transform_3, window_bounds = array<i64: 128, 128>}, {pipeline_mode = #tpu.pipeline_mode<synchronous>, transform_indices = @transform_4, window_bounds = array<i64: 1, 128>}, {pipeline_mode = #tpu.pipeline_mode<synchronous>, transform_indices = @transform_5, window_bounds = array<i64: 128, 128>}, {pipeline_mode = #tpu.pipeline_mode<synchronous>, transform_indices = @transform_6, window_bounds = array<i64: 128, 128>}, {pipeline_mode = #tpu.pipeline_mode<synchronous>, transform_indices = @transform_7, window_bounds = array<i64: 1, 128>}, {transform_indices = @transform_8, window_bounds = array<i64: 32, 128>}]} {
    %c0_i32 = arith.constant 0 : i32
    %0 = arith.cmpi eq, %arg0, %c0_i32 : i32
    %1 = arith.extui %0 : i1 to i32
    %c0_i32_0 = arith.constant 0 : i32
    %2 = arith.cmpi ne, %1, %c0_i32_0 : i32
    scf.if %2 {
      %cst_76 = arith.constant 0.000000e+00 : f32
      %131 = vector.broadcast %cst_76 : f32 to vector<2x8x128xf32>
      %c0_77 = arith.constant 0 : index
      %c0_78 = arith.constant 0 : index
      %c0_79 = arith.constant 0 : index
      %132 = vector.load %arg10[%c0_77, %c0_78, %c0_79] : memref<2x8x128xf32, #tpu.memory_space<vmem>>, vector<2x8x128xf32>
      tpu.vector_store %arg10[%c0_77, %c0_78, %c0_79], %131 {strides = array<i32>} : memref<2x8x128xf32, #tpu.memory_space<vmem>>, vector<2x8x128xf32>,
    } else {
    }
    %c0 = arith.constant 0 : index
    %c0_1 = arith.constant 0 : index
    %3 = vector.load %arg1[%c0, %c0_1] : memref<8x1xi32, #tpu.memory_space<vmem>>, vector<8x1xi32>
    %c4_i32 = arith.constant 4 : i32
    %4 = arith.muli %arg0, %c4_i32 : i32
    %c0_2 = arith.constant 0 : index
    %c0_3 = arith.constant 0 : index
    %5 = vector.load %arg3[%c0_2, %c0_3] : memref<128x128xf32, #tpu.memory_space<vmem>>, vector<128x128xf32>
    %c0_4 = arith.constant 0 : index
    %c0_5 = arith.constant 0 : index
    %6 = vector.load %arg4[%c0_4, %c0_5] : memref<128x128xf32, #tpu.memory_space<vmem>>, vector<128x128xf32>
    %c0_6 = arith.constant 0 : index
    %c0_7 = arith.constant 0 : index
    %7 = vector.load %arg5[%c0_6, %c0_7] : memref<1x128xf32, #tpu.memory_space<vmem>>, vector<1x128xf32>
    %c0_8 = arith.constant 0 : index
    %c0_9 = arith.constant 0 : index
    %8 = vector.load %arg2[%c0_8, %c0_9] : memref<32x128xf32, #tpu.memory_space<vmem>>, vector<32x128xf32>
    %cst = arith.constant dense<0.000000e+00> : vector<32x128xf32>
    %9 = tpu.matmul %8, %5, %cst {dimension_numbers = #tpu.dot_dimension_numbers<[1], [0], [0], [1], [0, 0, 1, 1], [], []>} : vector<32x128xf32>, vector<128x128xf32>, vector<32x128xf32> -> vector<32x128xf32>
    %10 = vector.broadcast %7 : vector<1x128xf32> to vector<32x128xf32>
    %11 = arith.addf %9, %10 : vector<32x128xf32>
    %c0_10 = arith.constant 0 : index
    %c0_11 = arith.constant 0 : index
    %12 = vector.load %arg9[%c0_10, %c0_11] : memref<32x128xf32, #tpu.memory_space<vmem>>, vector<32x128xf32>
    tpu.vector_store %arg9[%c0_10, %c0_11], %11 {strides = array<i32>} : memref<32x128xf32, #tpu.memory_space<vmem>>, vector<32x128xf32>,
    %c0_12 = arith.constant 0 : index
    %c0_13 = arith.constant 0 : index
    %c0_14 = arith.constant 0 : index
    %13 = vector.load %arg10[%c0_12, %c0_13, %c0_14] : memref<2x8x128xf32, #tpu.memory_space<vmem>>, vector<1x8x128xf32>
    %14 = vector.shape_cast %13 : vector<1x8x128xf32> to vector<8x128xf32>
    %c0_i32_15 = arith.constant 0 : i32
    %c8_i32 = arith.constant 8 : i32
    %15 = arith.muli %c0_i32_15, %c8_i32 : i32
    %16 = tpu.assume_multiple %15, 8 : i32
    %17 = arith.index_cast %16 : i32 to index
    %c0_16 = arith.constant 0 : index
    %18 = vector.load %arg9[%17, %c0_16] : memref<32x128xf32, #tpu.memory_space<vmem>>, vector<8x128xf32>
    %cst_17 = arith.constant dense<0.000000e+00> : vector<8x128xf32>
    %19 = tpu.matmul %14, %6, %cst_17 {dimension_numbers = #tpu.dot_dimension_numbers<[1], [0], [0], [1], [0, 0, 1, 1], [], []>} : vector<8x128xf32>, vector<128x128xf32>, vector<8x128xf32> -> vector<8x128xf32>
    %20 = arith.addf %18, %19 : vector<8x128xf32>
    %21 = math.tanh %20 : vector<8x128xf32>
    %22 = arith.index_cast %16 : i32 to index
    %c0_18 = arith.constant 0 : index
    %23 = vector.load %arg9[%22, %c0_18] : memref<32x128xf32, #tpu.memory_space<vmem>>, vector<8x128xf32>
    tpu.vector_store %arg9[%22, %c0_18], %21 {strides = array<i32>} : memref<32x128xf32, #tpu.memory_space<vmem>>, vector<8x128xf32>,
    %c1_i32 = arith.constant 1 : i32
    %c8_i32_19 = arith.constant 8 : i32
    %24 = arith.muli %c1_i32, %c8_i32_19 : i32
    %25 = tpu.assume_multiple %24, 8 : i32
    %26 = arith.index_cast %25 : i32 to index
    %c0_20 = arith.constant 0 : index
    %27 = vector.load %arg9[%26, %c0_20] : memref<32x128xf32, #tpu.memory_space<vmem>>, vector<8x128xf32>
    %cst_21 = arith.constant dense<0.000000e+00> : vector<8x128xf32>
    %28 = tpu.matmul %21, %6, %cst_21 {dimension_numbers = #tpu.dot_dimension_numbers<[1], [0], [0], [1], [0, 0, 1, 1], [], []>} : vector<8x128xf32>, vector<128x128xf32>, vector<8x128xf32> -> vector<8x128xf32>
    %29 = arith.addf %27, %28 : vector<8x128xf32>
    %30 = math.tanh %29 : vector<8x128xf32>
    %31 = arith.index_cast %25 : i32 to index
    %c0_22 = arith.constant 0 : index
    %32 = vector.load %arg9[%31, %c0_22] : memref<32x128xf32, #tpu.memory_space<vmem>>, vector<8x128xf32>
    tpu.vector_store %arg9[%31, %c0_22], %30 {strides = array<i32>} : memref<32x128xf32, #tpu.memory_space<vmem>>, vector<8x128xf32>,
    %c2_i32 = arith.constant 2 : i32
    %c8_i32_23 = arith.constant 8 : i32
    %33 = arith.muli %c2_i32, %c8_i32_23 : i32
    %34 = tpu.assume_multiple %33, 8 : i32
    %35 = arith.index_cast %34 : i32 to index
    %c0_24 = arith.constant 0 : index
    %36 = vector.load %arg9[%35, %c0_24] : memref<32x128xf32, #tpu.memory_space<vmem>>, vector<8x128xf32>
    %cst_25 = arith.constant dense<0.000000e+00> : vector<8x128xf32>
    %37 = tpu.matmul %30, %6, %cst_25 {dimension_numbers = #tpu.dot_dimension_numbers<[1], [0], [0], [1], [0, 0, 1, 1], [], []>} : vector<8x128xf32>, vector<128x128xf32>, vector<8x128xf32> -> vector<8x128xf32>
    %38 = arith.addf %36, %37 : vector<8x128xf32>
    %39 = math.tanh %38 : vector<8x128xf32>
    %40 = arith.index_cast %34 : i32 to index
    %c0_26 = arith.constant 0 : index
    %41 = vector.load %arg9[%40, %c0_26] : memref<32x128xf32, #tpu.memory_space<vmem>>, vector<8x128xf32>
    tpu.vector_store %arg9[%40, %c0_26], %39 {strides = array<i32>} : memref<32x128xf32, #tpu.memory_space<vmem>>, vector<8x128xf32>,
    %c3_i32 = arith.constant 3 : i32
    %c8_i32_27 = arith.constant 8 : i32
    %42 = arith.muli %c3_i32, %c8_i32_27 : i32
    %43 = tpu.assume_multiple %42, 8 : i32
    %44 = arith.index_cast %43 : i32 to index
    %c0_28 = arith.constant 0 : index
    %45 = vector.load %arg9[%44, %c0_28] : memref<32x128xf32, #tpu.memory_space<vmem>>, vector<8x128xf32>
    %cst_29 = arith.constant dense<0.000000e+00> : vector<8x128xf32>
    %46 = tpu.matmul %39, %6, %cst_29 {dimension_numbers = #tpu.dot_dimension_numbers<[1], [0], [0], [1], [0, 0, 1, 1], [], []>} : vector<8x128xf32>, vector<128x128xf32>, vector<8x128xf32> -> vector<8x128xf32>
    %47 = arith.addf %45, %46 : vector<8x128xf32>
    %48 = math.tanh %47 : vector<8x128xf32>
    %49 = arith.index_cast %43 : i32 to index
    %c0_30 = arith.constant 0 : index
    %50 = vector.load %arg9[%49, %c0_30] : memref<32x128xf32, #tpu.memory_space<vmem>>, vector<8x128xf32>
    tpu.vector_store %arg9[%49, %c0_30], %48 {strides = array<i32>} : memref<32x128xf32, #tpu.memory_space<vmem>>, vector<8x128xf32>,
    %c4_i32_31 = arith.constant 4 : i32
    %c0_32 = arith.constant 0 : index
    %c0_33 = arith.constant 0 : index
    %c0_34 = arith.constant 0 : index
    %51 = vector.load %arg10[%c0_32, %c0_33, %c0_34] : memref<2x8x128xf32, #tpu.memory_space<vmem>>, vector<1x8x128xf32>
    %52 = vector.shape_cast %51 : vector<1x8x128xf32> to vector<8x128xf32>
    %53 = vector.shape_cast %48 : vector<8x128xf32> to vector<1x8x128xf32>
    tpu.vector_store %arg10[%c0_32, %c0_33, %c0_34], %53 {strides = array<i32>} : memref<2x8x128xf32, #tpu.memory_space<vmem>>, vector<1x8x128xf32>,
    %c0_35 = arith.constant 0 : index
    %c0_36 = arith.constant 0 : index
    %54 = vector.load %arg6[%c0_35, %c0_36] : memref<128x128xf32, #tpu.memory_space<vmem>>, vector<128x128xf32>
    %c0_37 = arith.constant 0 : index
    %c0_38 = arith.constant 0 : index
    %55 = vector.load %arg7[%c0_37, %c0_38] : memref<128x128xf32, #tpu.memory_space<vmem>>, vector<128x128xf32>
    %c0_39 = arith.constant 0 : index
    %c0_40 = arith.constant 0 : index
    %56 = vector.load %arg8[%c0_39, %c0_40] : memref<1x128xf32, #tpu.memory_space<vmem>>, vector<1x128xf32>
    %c0_41 = arith.constant 0 : index
    %c0_42 = arith.constant 0 : index
    %57 = vector.load %arg9[%c0_41, %c0_42] : memref<32x128xf32, #tpu.memory_space<vmem>>, vector<32x128xf32>
    %cst_43 = arith.constant dense<0.000000e+00> : vector<32x128xf32>
    %58 = tpu.matmul %57, %54, %cst_43 {dimension_numbers = #tpu.dot_dimension_numbers<[1], [0], [0], [1], [0, 0, 1, 1], [], []>} : vector<32x128xf32>, vector<128x128xf32>, vector<32x128xf32> -> vector<32x128xf32>
    %59 = vector.broadcast %56 : vector<1x128xf32> to vector<32x128xf32>
    %60 = arith.addf %58, %59 : vector<32x128xf32>
    %c0_44 = arith.constant 0 : index
    %c0_45 = arith.constant 0 : index
    %61 = vector.load %arg9[%c0_44, %c0_45] : memref<32x128xf32, #tpu.memory_space<vmem>>, vector<32x128xf32>
    tpu.vector_store %arg9[%c0_44, %c0_45], %60 {strides = array<i32>} : memref<32x128xf32, #tpu.memory_space<vmem>>, vector<32x128xf32>,
    %c1 = arith.constant 1 : index
    %c0_46 = arith.constant 0 : index
    %c0_47 = arith.constant 0 : index
    %62 = vector.load %arg10[%c1, %c0_46, %c0_47] : memref<2x8x128xf32, #tpu.memory_space<vmem>>, vector<1x8x128xf32>
    %63 = vector.shape_cast %62 : vector<1x8x128xf32> to vector<8x128xf32>
    %c0_i32_48 = arith.constant 0 : i32
    %c8_i32_49 = arith.constant 8 : i32
    %64 = arith.muli %c0_i32_48, %c8_i32_49 : i32
    %65 = tpu.assume_multiple %64, 8 : i32
    %66 = arith.index_cast %65 : i32 to index
    %c0_50 = arith.constant 0 : index
    %67 = vector.load %arg9[%66, %c0_50] : memref<32x128xf32, #tpu.memory_space<vmem>>, vector<8x128xf32>
    %cst_51 = arith.constant dense<0.000000e+00> : vector<8x128xf32>
    %68 = tpu.matmul %63, %55, %cst_51 {dimension_numbers = #tpu.dot_dimension_numbers<[1], [0], [0], [1], [0, 0, 1, 1], [], []>} : vector<8x128xf32>, vector<128x128xf32>, vector<8x128xf32> -> vector<8x128xf32>
    %69 = arith.addf %67, %68 : vector<8x128xf32>
    %70 = math.tanh %69 : vector<8x128xf32>
    %71 = arith.addi %4, %c0_i32_48 : i32
    %72 = vector.broadcast %71 : i32 to vector<8x1xi32>
    %73 = arith.cmpi slt, %72, %3 : vector<8x1xi32>
    %cst_52 = arith.constant -7.000000e+00 : f32
    %74 = vector.shape_cast %73 : vector<8x1xi1> to vector<8x1xi1>
    %75 = vector.broadcast %74 : vector<8x1xi1> to vector<8x128xi1>
    %76 = vector.broadcast %cst_52 : f32 to vector<8x128xf32>
    %77 = arith.select %75, %70, %76 : vector<8x128xi1>, vector<8x128xf32>
    %78 = arith.index_cast %65 : i32 to index
    %c0_53 = arith.constant 0 : index
    %79 = vector.load %arg9[%78, %c0_53] : memref<32x128xf32, #tpu.memory_space<vmem>>, vector<8x128xf32>
    tpu.vector_store %arg9[%78, %c0_53], %77 {strides = array<i32>} : memref<32x128xf32, #tpu.memory_space<vmem>>, vector<8x128xf32>,
    %c1_i32_54 = arith.constant 1 : i32
    %c8_i32_55 = arith.constant 8 : i32
    %80 = arith.muli %c1_i32_54, %c8_i32_55 : i32
    %81 = tpu.assume_multiple %80, 8 : i32
    %82 = arith.index_cast %81 : i32 to index
    %c0_56 = arith.constant 0 : index
    %83 = vector.load %arg9[%82, %c0_56] : memref<32x128xf32, #tpu.memory_space<vmem>>, vector<8x128xf32>
    %cst_57 = arith.constant dense<0.000000e+00> : vector<8x128xf32>
    %84 = tpu.matmul %70, %55, %cst_57 {dimension_numbers = #tpu.dot_dimension_numbers<[1], [0], [0], [1], [0, 0, 1, 1], [], []>} : vector<8x128xf32>, vector<128x128xf32>, vector<8x128xf32> -> vector<8x128xf32>
    %85 = arith.addf %83, %84 : vector<8x128xf32>
    %86 = math.tanh %85 : vector<8x128xf32>
    %87 = arith.addi %4, %c1_i32_54 : i32
    %88 = vector.broadcast %87 : i32 to vector<8x1xi32>
    %89 = arith.cmpi slt, %88, %3 : vector<8x1xi32>
    %cst_58 = arith.constant -7.000000e+00 : f32
    %90 = vector.shape_cast %89 : vector<8x1xi1> to vector<8x1xi1>
    %91 = vector.broadcast %90 : vector<8x1xi1> to vector<8x128xi1>
    %92 = vector.broadcast %cst_58 : f32 to vector<8x128xf32>
    %93 = arith.select %91, %86, %92 : vector<8x128xi1>, vector<8x128xf32>
    %94 = arith.index_cast %81 : i32 to index
    %c0_59 = arith.constant 0 : index
    %95 = vector.load %arg9[%94, %c0_59] : memref<32x128xf32, #tpu.memory_space<vmem>>, vector<8x128xf32>
    tpu.vector_store %arg9[%94, %c0_59], %93 {strides = array<i32>} : memref<32x128xf32, #tpu.memory_space<vmem>>, vector<8x128xf32>,
    %c2_i32_60 = arith.constant 2 : i32
    %c8_i32_61 = arith.constant 8 : i32
    %96 = arith.muli %c2_i32_60, %c8_i32_61 : i32
    %97 = tpu.assume_multiple %96, 8 : i32
    %98 = arith.index_cast %97 : i32 to index
    %c0_62 = arith.constant 0 : index
    %99 = vector.load %arg9[%98, %c0_62] : memref<32x128xf32, #tpu.memory_space<vmem>>, vector<8x128xf32>
    %cst_63 = arith.constant dense<0.000000e+00> : vector<8x128xf32>
    %100 = tpu.matmul %86, %55, %cst_63 {dimension_numbers = #tpu.dot_dimension_numbers<[1], [0], [0], [1], [0, 0, 1, 1], [], []>} : vector<8x128xf32>, vector<128x128xf32>, vector<8x128xf32> -> vector<8x128xf32>
    %101 = arith.addf %99, %100 : vector<8x128xf32>
    %102 = math.tanh %101 : vector<8x128xf32>
    %103 = arith.addi %4, %c2_i32_60 : i32
    %104 = vector.broadcast %103 : i32 to vector<8x1xi32>
    %105 = arith.cmpi slt, %104, %3 : vector<8x1xi32>
    %cst_64 = arith.constant -7.000000e+00 : f32
    %106 = vector.shape_cast %105 : vector<8x1xi1> to vector<8x1xi1>
    %107 = vector.broadcast %106 : vector<8x1xi1> to vector<8x128xi1>
    %108 = vector.broadcast %cst_64 : f32 to vector<8x128xf32>
    %109 = arith.select %107, %102, %108 : vector<8x128xi1>, vector<8x128xf32>
    %110 = arith.index_cast %97 : i32 to index
    %c0_65 = arith.constant 0 : index
    %111 = vector.load %arg9[%110, %c0_65] : memref<32x128xf32, #tpu.memory_space<vmem>>, vector<8x128xf32>
    tpu.vector_store %arg9[%110, %c0_65], %109 {strides = array<i32>} : memref<32x128xf32, #tpu.memory_space<vmem>>, vector<8x128xf32>,
    %c3_i32_66 = arith.constant 3 : i32
    %c8_i32_67 = arith.constant 8 : i32
    %112 = arith.muli %c3_i32_66, %c8_i32_67 : i32
    %113 = tpu.assume_multiple %112, 8 : i32
    %114 = arith.index_cast %113 : i32 to index
    %c0_68 = arith.constant 0 : index
    %115 = vector.load %arg9[%114, %c0_68] : memref<32x128xf32, #tpu.memory_space<vmem>>, vector<8x128xf32>
    %cst_69 = arith.constant dense<0.000000e+00> : vector<8x128xf32>
    %116 = tpu.matmul %102, %55, %cst_69 {dimension_numbers = #tpu.dot_dimension_numbers<[1], [0], [0], [1], [0, 0, 1, 1], [], []>} : vector<8x128xf32>, vector<128x128xf32>, vector<8x128xf32> -> vector<8x128xf32>
    %117 = arith.addf %115, %116 : vector<8x128xf32>
    %118 = math.tanh %117 : vector<8x128xf32>
    %119 = arith.addi %4, %c3_i32_66 : i32
    %120 = vector.broadcast %119 : i32 to vector<8x1xi32>
    %121 = arith.cmpi slt, %120, %3 : vector<8x1xi32>
    %cst_70 = arith.constant -7.000000e+00 : f32
    %122 = vector.shape_cast %121 : vector<8x1xi1> to vector<8x1xi1>
    %123 = vector.broadcast %122 : vector<8x1xi1> to vector<8x128xi1>
    %124 = vector.broadcast %cst_70 : f32 to vector<8x128xf32>
    %125 = arith.select %123, %118, %124 : vector<8x128xi1>, vector<8x128xf32>
    %126 = arith.index_cast %113 : i32 to index
    %c0_71 = arith.constant 0 : index
    %127 = vector.load %arg9[%126, %c0_71] : memref<32x128xf32, #tpu.memory_space<vmem>>, vector<8x128xf32>
    tpu.vector_store %arg9[%126, %c0_71], %125 {strides = array<i32>} : memref<32x128xf32, #tpu.memory_space<vmem>>, vector<8x128xf32>,
    %c4_i32_72 = arith.constant 4 : i32
    %c1_73 = arith.constant 1 : index
    %c0_74 = arith.constant 0 : index
    %c0_75 = arith.constant 0 : index
    %128 = vector.load %arg10[%c1_73, %c0_74, %c0_75] : memref<2x8x128xf32, #tpu.memory_space<vmem>>, vector<1x8x128xf32>
    %129 = vector.shape_cast %128 : vector<1x8x128xf32> to vector<8x128xf32>
    %130 = vector.shape_cast %118 : vector<8x128xf32> to vector<1x8x128xf32>
    tpu.vector_store %arg10[%c1_73, %c0_74, %c0_75], %130 {strides = array<i32>} : memref<2x8x128xf32, #tpu.memory_space<vmem>>, vector<1x8x128xf32>,
    return
  }
  func.func @transform_0(%arg0: i32) -> (i32, i32) {
    %c0_i32 = arith.constant 0 : i32
    %c0_i32_0 = arith.constant 0 : i32
    %c0_i32_1 = arith.constant 0 : i32
    return %c0_i32, %c0_i32_0 : i32, i32
  }
  func.func @transform_1(%arg0: i32) -> (i32, i32) {
    %c0_i32 = arith.constant 0 : i32
    %c0_i32_0 = arith.constant 0 : i32
    return %arg0, %c0_i32 : i32, i32
  }
  func.func @transform_2(%arg0: i32) -> (i32, i32) {
    %c0_i32 = arith.constant 0 : i32
    %c0_i32_0 = arith.constant 0 : i32
    %c0_i32_1 = arith.constant 0 : i32
    return %c0_i32, %c0_i32_0 : i32, i32
  }
  func.func @transform_3(%arg0: i32) -> (i32, i32) {
    %c0_i32 = arith.constant 0 : i32
    %c0_i32_0 = arith.constant 0 : i32
    %c0_i32_1 = arith.constant 0 : i32
    return %c0_i32, %c0_i32_0 : i32, i32
  }
  func.func @transform_4(%arg0: i32) -> (i32, i32) {
    %c0_i32 = arith.constant 0 : i32
    %c0_i32_0 = arith.constant 0 : i32
    %c0_i32_1 = arith.constant 0 : i32
    return %c0_i32, %c0_i32_0 : i32, i32
  }
  func.func @transform_5(%arg0: i32) -> (i32, i32) {
    %c0_i32 = arith.constant 0 : i32
    %c0_i32_0 = arith.constant 0 : i32
    %c0_i32_1 = arith.constant 0 : i32
    return %c0_i32, %c0_i32_0 : i32, i32
  }
  func.func @transform_6(%arg0: i32) -> (i32, i32) {
    %c0_i32 = arith.constant 0 : i32
    %c0_i32_0 = arith.constant 0 : i32
    %c0_i32_1 = arith.constant 0 : i32
    return %c0_i32, %c0_i32_0 : i32, i32
  }
  func.func @transform_7(%arg0: i32) -> (i32, i32) {
    %c0_i32 = arith.constant 0 : i32
    %c0_i32_0 = arith.constant 0 : i32
    %c0_i32_1 = arith.constant 0 : i32
    return %c0_i32, %c0_i32_0 : i32, i32
  }
  func.func @transform_8(%arg0: i32) -> (i32, i32) {
    %c0_i32 = arith.constant 0 : i32
    %c0_i32_0 = arith.constant 0 : i32
    return %arg0, %c0_i32 : i32, i32
  }
}

</mosaic_0001>

<bundles_post_ra>
// kernel: tpu_custom_call.1
= control target key start
LH: loop header
LB: loop body
LE: loop exit
PB: predicated region body
PF: predicated region fallthrough
CT: control target
= control target key end

     0   :  { %s2987_s0 = inlined_call_operand.vmem [shape: s32[8,1], index: 0, kind: input, shape index: {}]   ;;  %s2988_s1 = inlined_call_operand.hbm [shape: f32[64,128], index: 1, kind: input, shape index: {}]   ;;  %s2989_s2 = inlined_call_operand.hbm [shape: f32[128,128], index: 2, kind: input, shape index: {}]   ;;  %s2990_s3 = inlined_call_operand.hbm [shape: f32[128,128], index: 3, kind: input, shape index: {}]   ;;  %s2991_s4 = inlined_call_operand.vmem [shape: f32[1,128], index: 4, kind: input, shape index: {}]   ;;  %s2992_s5 = inlined_call_operand.hbm [shape: f32[128,128], index: 5, kind: input, shape index: {}]   ;;  %s2993_s6 = inlined_call_operand.hbm [shape: f32[128,128], index: 6, kind: input, shape index: {}]   ;;  %s2994_s7 = inlined_call_operand.vmem [shape: f32[1,128], index: 7, kind: input, shape index: {}]   ;;  %s2995_s8 = inlined_call_operand.hbm [shape: f32[64,128], index: 8, kind: output, shape index: {}]  }
   0x1   :  { %3002 = sst [smem:[#allocation17_spill]] %s2989_s2 }
   0x2   :  { %3003 = sst [smem:[#allocation18_spill]] %s2990_s3 }
   0x3   :  { %13 = vsyncpa [#allocation4], 0 }
   0x4   :  { %15 = vsyncpa [#allocation4 + $0x1], 0 }
   0x5   :  { %16 = vsyncpa [#allocation7], 0 }
   0x6   :  { %17 = vsyncpa [#allocation10], 0 }
   0x7   :  { %18 = vsyncpa [#allocation5], 0 }
   0x8   :  { %20 = vsyncpa [#allocation5 + $0x1], 0  ;;  %s2366_s27 = smov 0   ;;  %s2368_s28 = smov 0  }
   0x9   :  { %s2370_s29 = smov 0   ;;  %s2372_s30 = smov 0  }
   0xa LB: > { %s2387_s9 = sadd.s32 4294967295, %s2305_s30   ;;  %s1416_s10 = sadd.s32 4294967294, %s2305_s30   ;;  %s2305_s30 = sphi %s2372_s30, %s3027_s30   ;;  %s2301_s29 = sphi %s2370_s29, %s3026_s29   ;;  %s2297_s28 = sphi %s2368_s28, %s3025_s28   ;;  %s2293_s27 = sphi %s2366_s27, %s3024_s27  }
   0xb   : > { %p67_p0 = scmp.ne.s32.totalorder %s2297_s28, %s2293_s27  ;;  %p2996_p1 = scmp.eq.s32.totalorder %s2387_s9, 0 }
   0xc   : > { %p217_p2 = scmp.eq.s32.totalorder %s2387_s9, 1  ;;  %p223_p3 = scmp.eq.s32.totalorder %s1416_s10, 1 }
   0xd   : > { %p2396_p4 = por %p2996_p1, %p67_p0  ;;  %p1417_p5 = scmp.ge.s32.totalorder %s2305_s30, 1 }
   0xe   : > { %p2401_p6 = por %p223_p3, %p67_p0  ;;  %p230_p7 = scmp.lt.s32.totalorder %s2305_s30, 3 }
   0xf   : > { %s3004_s11 = scalar_select %p2396_p4, 1, 0 }
  0x10   : > { %s3005_s12 = scalar_select %p2401_p6, 1, 0 }
  0x11   : > { %p2407_p9 = pnand %p1417_p5, %p230_p7  ;;  %s2307_s14 = smov [#allocation6]  }
  0x12   : > { %s245_s15 = sshll.u32 %s2307_s14, 4  ;;  %s2308_s17 = smov [#allocation9]   ;;  %s246_s15 = int_to_ptr.vmem [resolvable:$true] %s245_s15 }
  0x13   : > { %s3006_s13 = scalar_select %p2407_p9, 1, 0 }
  0x14   : > { %p2008_p10 = pneg %p2407_p9  ;;  %s274_s18 = sshll.u32 %s2308_s17, 4  ;;  %s275_s18 = int_to_ptr.vmem [resolvable:$true] %s274_s18 }
  0x15   : > { %s2309_s19 = smov [#allocation8]   ;;  %s2112_s21 = scalar_lea.vmem %s246_s15, 2048 }
  0x16   : > { %p2416_p12 = pnand %p2008_p10, %p2996_p1  ;;  %s258_s20 = sshll.u32 %s2309_s19, 4  ;;  %s259_s20 = int_to_ptr.vmem [resolvable:$true] %s258_s20 }
  0x17   : > { %p2113_p0 = scmp.ne.s32.totalorder %s246_s15, %s2112_s21  ;;  %p2120_p7 = scmp.lt.s32.totalorder %s246_s15, %s246_s15 }
  0x18   : > { %p2103_p13 = pneg %p2416_p12  ;;  %p2121_p10 = scmp.lt.s32.totalorder %s2112_s21, %s2112_s21 }
  0x1a   : > { %p2115_p3 = pnand %p2113_p0, %p2103_p13  ;;  %p2122_p11 = por %p2121_p10, %p2120_p7 }
  0x1c   : > { %p2116_p5 = pneg %p2115_p3 }
  0x1e   : > { %p2123_p8 = pnand %p2122_p11, %p2116_p5 }
  0x20   : > { %2126 = shalt.err (!%p2123_p8)
}
  0x21   : > { %s2997_s22 = smov 128   ;;  %s2998_s23 = smov 8  }
  0x22   : > { %s3008_s2 = sld [smem:[#allocation17_spill]]  ;;  %s2138_s26 = scalar_lea.vmem %s275_s18, 2048 }
  0x23   : > { %p2139_p0 = scmp.ne.s32.totalorder %s275_s18, %s2138_s26  ;;  %p2146_p11 = scmp.lt.s32.totalorder %s275_s18, %s275_s18 }
  0x24   : > { %p2147_p8 = scmp.lt.s32.totalorder %s2138_s26, %s2138_s26 }
  0x25   : > { %p2141_p3 = pnand %p2139_p0, %p2103_p13 }
  0x26   : > { %p2148_p5 = por %p2147_p8, %p2146_p11 }
  0x27   : > { %p2142_p7 = pneg %p2141_p3 }
  0x28   : > { %2011 = dma.hbm_to_vmem [thread:$0]  (!%p2416_p12), %s3008_s2, 2048, %s246_s15, [#allocation7], %s2997_s22, %s2997_s22, %s2998_s23  }
  0x29   : > { %p2149_p10 = pnand %p2148_p5, %p2142_p7 }
  0x2b   : > { %2152 = shalt.err (!%p2149_p10)
}
  0x2c   : > { %2017 = dma.hbm_to_vmem [thread:$0]  (!%p2416_p12), %s2992_s5, 2048, %s275_s18, [#allocation10], %s2997_s22, %s2997_s22, %s2998_s23  }
  0x2d   : > { %s2164_s15 = scalar_lea.vmem %s259_s20, 2048  ;;  %p2172_p11 = scmp.lt.s32.totalorder %s259_s20, %s259_s20 }
  0x2e   : > { %p2165_p1 = scmp.ne.s32.totalorder %s259_s20, %s2164_s15  ;;  %p2173_p7 = scmp.lt.s32.totalorder %s2164_s15, %s2164_s15 }
  0x30   : > { %p2167_p0 = pnand %p2165_p1, %p2103_p13  ;;  %p2174_p8 = por %p2173_p7, %p2172_p11 }
  0x32   : > { %p2168_p3 = pneg %p2167_p0 }
  0x34   : > { %p2175_p5 = pnand %p2174_p8, %p2168_p3 }
  0x36   : > { %2178 = shalt.err (!%p2175_p5)
}
  0x37   : > { %s3009_s3 = sld [smem:[#allocation18_spill]]  ;;  %s2312_s18 = smov [#allocation11]  }
  0x38   : > { %s287_s21 = sshll.u32 %s2312_s18, 4  ;;  %s288_s21 = int_to_ptr.vmem [resolvable:$true] %s287_s21 }
  0x39   : > { %s2190_s24 = scalar_lea.vmem %s288_s21, 2048  ;;  %p2198_p3 = scmp.lt.s32.totalorder %s288_s21, %s288_s21 }
  0x3a   : > { %p2191_p1 = scmp.ne.s32.totalorder %s288_s21, %s2190_s24  ;;  %p2199_p11 = scmp.lt.s32.totalorder %s2190_s24, %s2190_s24 }
  0x3c   : > { %p2193_p10 = pnand %p2191_p1, %p2103_p13  ;;  %p2200_p7 = por %p2199_p11, %p2198_p3 }
  0x3d   : > { %2014 = dma.hbm_to_vmem [thread:$0]  (!%p2416_p12), %s3009_s3, 2048, %s259_s20, [#allocation7], %s2997_s22, %s2997_s22, %s2998_s23  }
  0x3e   : > { %p2194_p0 = pneg %p2193_p10 }
  0x40   : > { %p2201_p8 = pnand %p2200_p7, %p2194_p0 }
  0x42   : > { %2204 = shalt.err (!%p2201_p8)
}
  0x43   : > { %2020 = dma.hbm_to_vmem [thread:$0]  (!%p2416_p12), %s2993_s6, 2048, %s288_s21, [#allocation10], %s2997_s22, %s2997_s22, %s2998_s23  }
  0x44   : > { %s2467_s26 = sadd.s32 1, %s2305_s30   ;;  %s54_s16 = sadd.s32 1, %s2301_s29 }
  0x45   : > { %s51_s10 = ssub.s32 %s2305_s30, %s2467_s26  ;;  %p61_p13 = scmp.ne.s32.totalorder %s2301_s29, %s2297_s28 }
  0x46   : > { %p52_p5 = scmp.eq.s32.totalorder %s51_s10, 0  ;;  %p62_p1 = scmp.eq.s32.totalorder %s2305_s30, 0 }
  0x47   : > { %p2477_p10 = por %p217_p2, %p61_p13  ;;  %p2033_p0 = scmp.lt.s32.totalorder %s2305_s30, 2 }
  0x48   : > { %s2483_s15 = scalar_select %p52_p5, %s2301_s29, %s54_s16  }
  0x49   : > { %s3010_s14 = scalar_select %p2477_p10, 1, 0 }
  0x4a   : > { %p63_p3 = por %p62_p1, %p61_p13  ;;  %s304_s17 = sand.u32 1, %s2301_s29  }
  0x4b   : > { %s1423_s19 = sshll.u32 %s304_s17, 5  ;;  %s1454_s18 = sshll.u32 %s2305_s30, 9 }
  0x4c   : > { %s2490_s20 = scalar_lea.hbm %s2988_s1, %s1454_s18  ;;  %s308_s25 = scalar_lea.vmem [#allocation3], %s1423_s19 }
  0x4d   : > { %s315_s10 = sshll.u32 %s308_s25, 4  ;;  %p2494_p2 = pnand %p2033_p0, %p63_p3  ;;  %s2492_s10 = int_to_ptr.vmem [resolvable:$true] %s315_s10 }
  0x4e   : > { %s2498_s16 = scalar_lea.sflag [#allocation4], %s304_s17  ;;  %s2205_s23 = scalar_lea.hbm %s2490_s20, 512 }
  0x4f   : > { %p2206_p12 = scmp.ne.s32.totalorder %s2490_s20, %s2205_s23  ;;  %p2207_p11 = pneg %p2494_p2 }
  0x50   : > { %s2210_s19 = scalar_lea.hbm %s2988_s1, 1024  ;;  %p2211_p13 = scmp.lt.s32.totalorder %s2490_s20, %s2988_s1 }
  0x51   : > { %p2208_p7 = pnand %p2207_p11, %p2206_p12  ;;  %p2212_p5 = scmp.lt.s32.totalorder %s2210_s19, %s2205_s23 }
  0x53   : > { %p2209_p8 = pneg %p2208_p7  ;;  %p2213_p1 = por %p2212_p5, %p2211_p13 }
  0x55   : > { %p2214_p0 = pnand %p2213_p1, %p2209_p8 }
  0x57   : > { %2217 = shalt.err (!%p2214_p0)
}
  0x58   : > { %s2218_s17 = scalar_lea.vmem %s2492_s10, 512  ;;  %s2313_s2 = smov [#allocation3]  }
  0x59   : > { %p2219_p3 = scmp.ne.s32.totalorder %s2492_s10, %s2218_s17  ;;  %s2223_s3 = sshll.u32 %s2313_s2, 4  ;;  %s2224_s3 = int_to_ptr.vmem [resolvable:$false] %s2223_s3 }
  0x5a   : > { %s2225_s18 = scalar_lea.vmem %s2224_s3, 1024  ;;  %p2226_p7 = scmp.lt.s32.totalorder %s2492_s10, %s2224_s3 }
  0x5b   : > { %p2221_p6 = pnand %p2219_p3, %p2207_p11  ;;  %p2227_p10 = scmp.lt.s32.totalorder %s2225_s18, %s2218_s17 }
  0x5d   : > { %p2222_p12 = pneg %p2221_p6  ;;  %p2228_p4 = por %p2227_p10, %p2226_p7 }
  0x5f   : > { %p2229_p9 = pnand %p2228_p4, %p2222_p12 }
  0x61   : > { %2232 = shalt.err (!%p2229_p9)
}
  0x62   : > { %s3012_s23 = smov 8   ;;  %s3013_s21 = smov 128  }
  0x63   : > { %2024 = dma.hbm_to_vmem [thread:$0]  (!%p2494_p2), %s2490_s20, 512, %s2492_s10, %s2498_s16, %s3013_s21, %s3013_s21, %s3012_s23  }
  0x64   : > { %p3014_p6 = scmp.ne.s32.totalorder %s3006_s13, 0 }
  0x65   : > { %s2525_s2 = sand.u32 (!%p3014_p6), 1, %s2297_s28   ;;  %p3015_p4 = scmp.ne.s32.totalorder (!%p3014_p6), %s3004_s11, 0 }
  0x66   : > { %327 = sbr.rel (%p3014_p6) target bundleno = 1670 (0x686), region = 52  ;;  %s1427_s3 = sshll.u32 (!%p3014_p6), %s2525_s2, 5 }
  0x67   : > { %s330_s19 = scalar_lea.sflag (!%p3014_p6), [#allocation4], %s2525_s2  ;;  %s2529_s24 = scalar_lea.vmem (!%p3014_p6), [#allocation3], %s1427_s3 }
  0x6b   : > { %2276 = dma.done.wait (%p3015_p4), %s330_s19, 512  }
  0x6c   : > { %2278 = vsyncadd (%p3015_p4), %s330_s19, 4294966784  ;;  %p3016_p9 = scmp.eq.s32.totalorder %s2387_s9, 0 }
  0x6e   : > { %2280 = dma.done.wait (%p3016_p9), [#allocation7], 4096   ;;  %p3017_p10 = pmov %p3016_p9 }
  0x6f   : > { %p3018_p2 = pmov %p3016_p9 }
  0x70   : > { %2282 = vsyncadd (%p3017_p10), [#allocation7], 4294963200 }
  0x71   : > { %2284 = dma.done.wait (%p3018_p2), [#allocation10], 4096   ;;  %p3019_p11 = pmov %p3018_p2 }
  0x72   : > { %s2543_s13 = scalar_lea.vmem [#allocation12], %s1427_s3  ;;  %p3020_p8 = scmp.ne.s32.totalorder %s2387_s9, 0 }
  0x73   : > { %2286 = vsyncadd (%p3019_p11), [#allocation10], 4294963200 }
  0x74   : > { %387 = sbr.rel (%p3020_p8) target bundleno = 123 (0x7b), region = 76 }
  0x79   : > { %v2314_v0 = vmov 0.0  }
  0x7a   : > { %388 = vst [vmem:[#allocation2] sm:$0xff] %v2314_v0  ;;  %389 = vst [vmem:[#allocation2 + $0x8] sm:$0xff] %v2314_v0 }
  0x7b PF: > { %v407_v1 = vld [vmem:[#allocation6 + $0x78] sm:$0xff]  ;;  %v406_v2 = vld [vmem:[#allocation6 + $0x70] sm:$0xff]  ;;  %v2315_v3 = vmov 0.0   ;;  %v405_v4 = vld [vmem:[#allocation6 + $0x68] sm:$0xff]  ;;  %vm2316_vm0 = vmmov 0   ;;  %s2801_s16 = sshll.u32 %s2387_s9, 2 }
  0x7c   : > { %1632 = vmatprep.subr.mxu0 %v407_v1  ;;  %1670 = vmatprep.subr.mxu1 %v2315_v3  ;;  %v2548_v5 = vld [vmem:[#allocation8 + $0x78] sm:$0xff]  ;;  %v2550_v6 = vld [vmem:[#allocation8 + $0x70] sm:$0xff]  ;;  %v404_v7 = vld [vmem:[#allocation6 + $0x60] sm:$0xff]  ;;  %s1114_s25 = sadd.s32 1, %s2801_s16  ;;  %s1197_s23 = sadd.s32 2, %s2801_s16 }
  0x7d   : > { %1633 = vmatpush3.msra.mxu0 %v407_v1  ;;  %1702 = vmatprep.mubr.msk.f32.mxu1 %vm2316_vm0, %v2315_v3  ;;  %v2556_v8 = vld [vmem:[#allocation8 + $0x68] sm:$0xff]  ;;  %v403_v9 = vld [vmem:[#allocation6 + $0x58] sm:$0xff]  ;;  %v2560_v10 = vld [vmem:[#allocation8 + $0x60] sm:$0xff]  ;;  %s1280_s21 = sadd.s32 3, %s2801_s16  ;;  %s1455_s3 = sshll.u32 %s2387_s9, 9 }
  0x7e   : > { %1634 = vmatprep.subr.mxu0 %v406_v2  ;;  %1671 = vmatpush3.msra.mxu1 %v2548_v5  ;;  %v402_v11 = vld [vmem:[#allocation6 + $0x50] sm:$0xff]  ;;  %v2564_v12 = vld [vmem:[#allocation8 + $0x58] sm:$0xff]  ;;  %v401_v13 = vld [vmem:[#allocation6 + $0x48] sm:$0xff]  ;;  %s1305_s19 = sshll.u32 %s2543_s13, 4  ;;  %s2941_s22 = scalar_lea.hbm %s2995_s8, %s1455_s3  ;;  %s2943_s19 = int_to_ptr.vmem [resolvable:$true] %s1305_s19 }
  0x7f   : > { %1635 = vmatpush3.msra.mxu0 %v406_v2  ;;  %1672 = vmatprep.subr.mxu1 %v2315_v3  ;;  %v2568_v14 = vld [vmem:[#allocation8 + $0x50] sm:$0xff]  ;;  %v400_v15 = vld [vmem:[#allocation6 + $0x40] sm:$0xff]  ;;  %v2572_v16 = vld [vmem:[#allocation8 + $0x48] sm:$0xff]  ;;  %s1292_s20 = scalar_lea.sflag [#allocation5], %s2525_s2  ;;  %s2233_s10 = scalar_lea.vmem %s2943_s19, 512 }
  0x80   : > { %1636 = vmatprep.subr.mxu0 %v405_v4  ;;  %1673 = vmatpush3.msra.mxu1 %v2550_v6  ;;  %v399_v17 = vld [vmem:[#allocation6 + $0x38] sm:$0xff]  ;;  %v2576_v18 = vld [vmem:[#allocation8 + $0x40] sm:$0xff]  ;;  %v398_v19 = vld [vmem:[#allocation6 + $0x30] sm:$0xff]  ;;  %p2234_p13 = scmp.ne.s32.totalorder %s2943_s19, %s2233_s10  ;;  %p3021_p5 = scmp.ne.s32.totalorder %s3010_s14, 0 }
  0x81   : > { %1637 = vmatpush3.msra.mxu0 %v405_v4  ;;  %1674 = vmatprep.subr.mxu1 %v2315_v3  ;;  %v2580_v20 = vld [vmem:[#allocation8 + $0x38] sm:$0xff]  ;;  %v397_v21 = vld [vmem:[#allocation6 + $0x28] sm:$0xff]  ;;  %v2584_v22 = vld [vmem:[#allocation8 + $0x30] sm:$0xff]  ;;  %s2318_s9 = smov [#allocation12]  }
  0x82   : > { %1638 = vmatprep.subr.mxu0 %v404_v7  ;;  %1675 = vmatpush3.msra.mxu1 %v2556_v8  ;;  %v396_v23 = vld [vmem:[#allocation6 + $0x20] sm:$0xff]  ;;  %v2590_v25 = vld [vmem:[#allocation8 + $0x28] sm:$0xff]  ;;  %v395_v26 = vld [vmem:[#allocation6 + $0x18] sm:$0xff]  ;;  %p2235_p1 = pnand %p2234_p13, %p3021_p5 }
  0x83   : > { %1639 = vmatpush3.msra.mxu0 %v404_v7  ;;  %1676 = vmatprep.subr.mxu1 %v2315_v3  ;;  %v425_v24 = vld [vmem:[%s2529_s24] sm:$0xff]  ;;  %v394_v28 = vld [vmem:[#allocation6 + $0x10] sm:$0xff]  ;;  %v2597_v29 = vld [vmem:[#allocation8 + $0x18] sm:$0xff] }
  0x84   : > { %1640 = vmatprep.subr.mxu0 %v403_v9  ;;  %1677 = vmatpush3.msra.mxu1 %v2560_v10  ;;  %v2593_v27 = vld [vmem:[#allocation8 + $0x20] sm:$0xff]  ;;  %v393_v30 = vld [vmem:[#allocation6 + $0x8] sm:$0xff]  ;;  %v2601_v31 = vld [vmem:[#allocation8 + $0x10] sm:$0xff]  ;;  %p2236_p0 = pneg %p2235_p1 }
  0x85   : > { %1641 = vmatpush3.msra.mxu0 %v403_v9  ;;  %1678 = vmatprep.subr.mxu1 %v2315_v3  ;;  %v392_v32 = vld [vmem:[#allocation6] sm:$0xff]  ;;  %v2605_v33 = vld [vmem:[#allocation8 + $0x8] sm:$0xff]  ;;  %v524_v36 = vld [vmem:[#allocation2] sm:$0xff] }
  0x86   : > { %1642 = vmatprep.subr.mxu0 %v402_v11  ;;  %1679 = vmatpush3.msra.mxu1 %v2564_v12  ;;  %v426_v34 = vld [vmem:[%s2529_s24 + $0x8] sm:$0xff]  ;;  %v2610_v35 = vld [vmem:[#allocation8] sm:$0xff]  ;;  %v427_v37 = vld [vmem:[%s2529_s24 + $0x10] sm:$0xff] }
  0x87   : > { %1643 = vmatpush3.msra.mxu0 %v402_v11  ;;  %1680 = vmatprep.subr.mxu1 %v2315_v3  ;;  %v428_v38 = vld [vmem:[%s2529_s24 + $0x18] sm:$0xff]  ;;  %v2689_v40 = vld [vmem:[%s2991_s4] ss:$0 sm:$0xff]  ;;  %v838_v56 = vld [vmem:[#allocation9 + $0x68] sm:$0xff] }
  0x88   : > { %1644 = vmatprep.subr.mxu0 %v401_v13  ;;  %1681 = vmatpush3.msra.mxu1 %v2568_v14  ;;  %v840_v47 = vld [vmem:[#allocation9 + $0x78] sm:$0xff]  ;;  %v839_v55 = vld [vmem:[#allocation9 + $0x70] sm:$0xff]  ;;  %v837_v57 = vld [vmem:[#allocation9 + $0x60] sm:$0xff] }
  0x89   : > { %1645 = vmatpush3.msra.mxu0 %v401_v13  ;;  %1682 = vmatprep.subr.mxu1 %v2315_v3  ;;  %v836_v58 = vld [vmem:[#allocation9 + $0x58] sm:$0xff]  ;;  %v835_v59 = vld [vmem:[#allocation9 + $0x50] sm:$0xff]  ;;  %v834_v60 = vld [vmem:[#allocation9 + $0x48] sm:$0xff] }
  0x8a   : > { %1646 = vmatprep.subr.mxu0 %v400_v15  ;;  %1683 = vmatpush3.msra.mxu1 %v2572_v16  ;;  %v833_v61 = vld [vmem:[#allocation9 + $0x40] sm:$0xff]  ;;  %v832_v62 = vld [vmem:[#allocation9 + $0x38] sm:$0xff]  ;;  %v831_v63 = vld [vmem:[#allocation9 + $0x30] sm:$0xff] }
  0x8b   : > { %1647 = vmatpush3.msra.mxu0 %v400_v15  ;;  %1684 = vmatprep.subr.mxu1 %v2315_v3  ;;  %v830_v0 = vld [vmem:[#allocation9 + $0x28] sm:$0xff]  ;;  %v829_v1 = vld [vmem:[#allocation9 + $0x20] sm:$0xff]  ;;  %v828_v2 = vld [vmem:[#allocation9 + $0x18] sm:$0xff] }
  0x8c   : > { %1648 = vmatprep.subr.mxu0 %v399_v17  ;;  %1685 = vmatpush3.msra.mxu1 %v2576_v18  ;;  %v827_v4 = vld [vmem:[#allocation9 + $0x10] sm:$0xff]  ;;  %v2732_v7 = vld [vmem:[#allocation11 + $0x78] sm:$0xff]  ;;  %v2739_v9 = vld [vmem:[#allocation11 + $0x68] sm:$0xff] }
  0x8d   : > { %1649 = vmatpush3.msra.mxu0 %v399_v17  ;;  %1686 = vmatprep.subr.mxu1 %v2315_v3  ;;  %v2747_v11 = vld [vmem:[#allocation11 + $0x58] sm:$0xff]  ;;  %v2755_v13 = vld [vmem:[#allocation11 + $0x48] sm:$0xff] }
  0x8e   : > { %1650 = vmatprep.subr.mxu0 %v398_v19  ;;  %1687 = vmatpush3.msra.mxu1 %v2580_v20  ;;  %v2763_v15 = vld [vmem:[#allocation11 + $0x38] sm:$0xff]  ;;  %v2771_v17 = vld [vmem:[#allocation11 + $0x28] sm:$0xff] }
  0x8f   : > { %1651 = vmatpush3.msra.mxu0 %v398_v19  ;;  %1688 = vmatprep.subr.mxu1 %v2315_v3  ;;  %v2779_v19 = vld [vmem:[#allocation11 + $0x18] sm:$0xff] }
  0x90   : > { %1652 = vmatprep.subr.mxu0 %v397_v21  ;;  %1689 = vmatpush3.msra.mxu1 %v2584_v22 }
  0x91   : > { %1653 = vmatpush3.msra.mxu0 %v397_v21  ;;  %1690 = vmatprep.subr.mxu1 %v2315_v3  ;;  %v2787_v21 = vld [vmem:[#allocation11 + $0x8] sm:$0xff] }
  0x92   : > { %1654 = vmatprep.subr.mxu0 %v396_v23  ;;  %1664 = vmatprep.mubr.f32.mxu0 %v425_v24  ;;  %v2317_v24 = vmov 0  }
  0x93   : > { %1655 = vmatpush3.msra.mxu0 %v396_v23  ;;  %1691 = vmatpush3.msra.mxu1 %v2590_v25  ;;  %v2798_v23 = vld [vmem:[%s2987_s0] sm:$0xff] }
  0x94   : > { %1656 = vmatprep.subr.mxu0 %v395_v26  ;;  %1692 = vmatprep.subr.mxu1 %v2315_v3 }
  0x95   : > { %1657 = vmatpush3.msra.mxu0 %v395_v26  ;;  %1693 = vmatpush3.msra.mxu1 %v2593_v27 }
  0x96   : > { %1658 = vmatprep.subr.mxu0 %v394_v28  ;;  %1694 = vmatprep.subr.mxu1 %v2315_v3 }
  0x97   : > { %1659 = vmatpush3.msra.mxu0 %v394_v28  ;;  %1695 = vmatpush3.msra.mxu1 %v2597_v29 }
  0x98   : > { %1660 = vmatprep.subr.mxu0 %v393_v30  ;;  %1696 = vmatprep.subr.mxu1 %v2315_v3 }
  0x99   : > { %1661 = vmatpush3.msra.mxu0 %v393_v30  ;;  %1697 = vmatpush3.msra.mxu1 %v2601_v31 }
  0x9a   : > { %1662 = vmatprep.subr.mxu0 %v392_v32  ;;  %1698 = vmatprep.subr.mxu1 %v2315_v3 }
  0x9b   : > { %1663 = vmatpush3.msra.mxu0 %v392_v32  ;;  %1699 = vmatpush3.msra.mxu1 %v2605_v33  ;;  %v958_v32 = vld [vmem:[#allocation2 + $0x8] sm:$0xff] }
  0x9c   : > { %1665 = vmatmul.mubr.f32.vlgmr.msra.gmra.mxu0 %v426_v34  ;;  %1700 = vmatprep.subr.mxu1 %v2315_v3 }
  0x9d   : > { %1701 = vmatpush3.msra.mxu1 %v2610_v35  ;;  %1705 = vmatprep.subr.mxu0 %v2315_v3 }
  0x9e   : > { %1703 = vmatmul.mubr.f32.vlgmr.msra.gmra.mxu1 %v524_v36  ;;  %1706 = vmatpush3.msra.mxu0 %v2548_v5 }
  0x9f   : > { %1707 = vmatprep.subr.mxu0 %v2315_v3  ;;  %1740 = vmatprep.subr.mxu1 %v2315_v3 }
  0xa0   : > { %1708 = vmatpush3.msra.mxu0 %v2550_v6  ;;  %1741 = vmatpush3.msra.mxu1 %v2548_v5 }
  0xa1   : > { %1709 = vmatprep.subr.mxu0 %v2315_v3  ;;  %1742 = vmatprep.subr.mxu1 %v2315_v3 }
  0xa2   : > { %1710 = vmatpush3.msra.mxu0 %v2556_v8  ;;  %1743 = vmatpush3.msra.mxu1 %v2550_v6 }
  0xa3   : > { %1711 = vmatprep.subr.mxu0 %v2315_v3  ;;  %1744 = vmatprep.subr.mxu1 %v2315_v3 }
  0xa4   : > { %1712 = vmatpush3.msra.mxu0 %v2560_v10  ;;  %1745 = vmatpush3.msra.mxu1 %v2556_v8 }
  0xa5   : > { %1713 = vmatprep.subr.mxu0 %v2315_v3  ;;  %1746 = vmatprep.subr.mxu1 %v2315_v3 }
  0xa6   : > { %1714 = vmatpush3.msra.mxu0 %v2564_v12  ;;  %1747 = vmatpush3.msra.mxu1 %v2560_v10 }
  0xa7   : > { %1715 = vmatprep.subr.mxu0 %v2315_v3  ;;  %1748 = vmatprep.subr.mxu1 %v2315_v3 }
  0xa8   : > { %1716 = vmatpush3.msra.mxu0 %v2568_v14  ;;  %1749 = vmatpush3.msra.mxu1 %v2564_v12 }
  0xa9   : > { %1717 = vmatprep.subr.mxu0 %v2315_v3  ;;  %1750 = vmatprep.subr.mxu1 %v2315_v3 }
  0xaa   : > { %1718 = vmatpush3.msra.mxu0 %v2572_v16  ;;  %1751 = vmatpush3.msra.mxu1 %v2568_v14 }
  0xab   : > { %1719 = vmatprep.subr.mxu0 %v2315_v3  ;;  %1752 = vmatprep.subr.mxu1 %v2315_v3 }
  0xac   : > { %1720 = vmatpush3.msra.mxu0 %v2576_v18  ;;  %1753 = vmatpush3.msra.mxu1 %v2572_v16 }
  0xad   : > { %1721 = vmatprep.subr.mxu0 %v2315_v3  ;;  %1754 = vmatprep.subr.mxu1 %v2315_v3 }
  0xae   : > { %1722 = vmatpush3.msra.mxu0 %v2580_v20  ;;  %1755 = vmatpush3.msra.mxu1 %v2576_v18 }
  0xaf   : > { %1723 = vmatprep.subr.mxu0 %v2315_v3  ;;  %1756 = vmatprep.subr.mxu1 %v2315_v3 }
  0xb0   : > { %1724 = vmatpush3.msra.mxu0 %v2584_v22  ;;  %1757 = vmatpush3.msra.mxu1 %v2580_v20 }
  0xb1   : > { %1725 = vmatprep.subr.mxu0 %v2315_v3  ;;  %1758 = vmatprep.subr.mxu1 %v2315_v3 }
  0xb2   : > { %1726 = vmatpush3.msra.mxu0 %v2590_v25  ;;  %1759 = vmatpush3.msra.mxu1 %v2584_v22 }
  0xb3   : > { %1727 = vmatprep.subr.mxu0 %v2315_v3  ;;  %1760 = vmatprep.subr.mxu1 %v2315_v3 }
  0xb4   : > { %1728 = vmatpush3.msra.mxu0 %v2593_v27  ;;  %1761 = vmatpush3.msra.mxu1 %v2590_v25 }
  0xb5   : > { %1729 = vmatprep.subr.mxu0 %v2315_v3  ;;  %1762 = vmatprep.subr.mxu1 %v2315_v3 }
  0xb6   : > { %1730 = vmatpush3.msra.mxu0 %v2597_v29  ;;  %1763 = vmatpush3.msra.mxu1 %v2593_v27 }
  0xb7   : > { %1731 = vmatprep.subr.mxu0 %v2315_v3  ;;  %1764 = vmatprep.subr.mxu1 %v2315_v3 }
  0xb8   : > { %1732 = vmatpush3.msra.mxu0 %v2601_v31  ;;  %1765 = vmatpush3.msra.mxu1 %v2597_v29 }
  0xb9   : > { %1733 = vmatprep.subr.mxu0 %v2315_v3  ;;  %1766 = vmatprep.subr.mxu1 %v2315_v3 }
  0xba   : > { %1734 = vmatpush3.msra.mxu0 %v2605_v33  ;;  %1767 = vmatpush3.msra.mxu1 %v2601_v31 }
  0xbb   : > { %1735 = vmatprep.subr.mxu0 %v2315_v3  ;;  %1768 = vmatprep.subr.mxu1 %v2315_v3 }
  0xbc   : > { %1736 = vmatpush3.msra.mxu0 %v2610_v35  ;;  %1769 = vmatpush3.msra.mxu1 %v2605_v33 }
  0xbd   : > { %1770 = vmatprep.subr.mxu1 %v2315_v3  ;;  %1772 = vmatprep.mubr.msk.f32.mxu1 %vm2316_vm0, %v2315_v3 }
  0xbe   : > { %1771 = vmatpush3.msra.mxu1 %v2610_v35  ;;  %1775 = vmatprep.subr.mxu0 %v2315_v3 }
  0xbf   : > { %1667 = vmatprep.mubr.f32.mxu0 %v427_v37  ;;  %1810 = vmatprep.subr.mxu1 %v840_v47 }
  0xc0   : > { %1668 = vmatmul.mubr.f32.gmra.mxu0 %v428_v38  ;;  %2083 = vset.pattern.permute.xlu0 %v2317_v24 }
  0xc1   : > { %1737 = vmatprep.mubr.msk.f32.mxu0 %vm2316_vm0, %v2315_v3  ;;  %2084 = vset.pattern.permute.xlu1 %v2317_v24 }
 0x15c   : > { %v1666_v39 = vpop.f32.mrf.mxu0 }
 0x15d   : > { %v507_v50 = vadd.f32 %v1666_v39, %v2689_v40 }
 0x15e   : > { %v501_v41 = vpop.f32.mrf.mxu0  ;;  %v592_v42 = vpop.f32.mrf.mxu1 }
 0x15f   : > { %v502_v43 = vadd.f32 %v2689_v40, %v501_v41 }
 0x160   : > { %v1704_v44 = vpop.f32.mrf.mxu1 }
 0x161   : > { %v596_v45 = vadd.f32 %v592_v42, %v502_v43  ;;  %v2888_v43 = vld [vmem:[%s2994_s7] ss:$0 sm:$0xff] }
 0x163   : > { %2085 = vtanh.f32 %v596_v45 }
 0x170   : > { %v2086_v46 = vpop.eup %2085 }
 0x171   : > { %1738 = vmatmul.mubr.f32.vlgmr.msra.gmra.mxu0 %v2086_v46 }
 0x172   : > { %1776 = vmatpush3.msra.mxu0 %v2548_v5  ;;  %1807 = vmatprep.mubr.msk.f32.mxu0 %vm2316_vm0, %v2315_v3  ;;  %v826_v5 = vld [vmem:[#allocation9 + $0x8] sm:$0xff] }
 0x173   : > { %1777 = vmatprep.subr.mxu0 %v2315_v3 }
 0x174   : > { %1778 = vmatpush3.msra.mxu0 %v2550_v6  ;;  %v825_v6 = vld [vmem:[#allocation9] sm:$0xff] }
 0x175   : > { %1779 = vmatprep.subr.mxu0 %v2315_v3 }
 0x176   : > { %1780 = vmatpush3.msra.mxu0 %v2556_v8  ;;  %v2735_v8 = vld [vmem:[#allocation11 + $0x70] sm:$0xff] }
 0x177   : > { %1781 = vmatprep.subr.mxu0 %v2315_v3 }
 0x178   : > { %1782 = vmatpush3.msra.mxu0 %v2560_v10  ;;  %v2743_v10 = vld [vmem:[#allocation11 + $0x60] sm:$0xff] }
 0x179   : > { %1783 = vmatprep.subr.mxu0 %v2315_v3 }
 0x17a   : > { %1784 = vmatpush3.msra.mxu0 %v2564_v12  ;;  %v2751_v12 = vld [vmem:[#allocation11 + $0x50] sm:$0xff] }
 0x17b   : > { %1785 = vmatprep.subr.mxu0 %v2315_v3 }
 0x17c   : > { %1786 = vmatpush3.msra.mxu0 %v2568_v14  ;;  %v2759_v14 = vld [vmem:[#allocation11 + $0x40] sm:$0xff] }
 0x17d   : > { %1787 = vmatprep.subr.mxu0 %v2315_v3 }
 0x17e   : > { %1788 = vmatpush3.msra.mxu0 %v2572_v16  ;;  %v2767_v16 = vld [vmem:[#allocation11 + $0x30] sm:$0xff] }
 0x17f   : > { %1789 = vmatprep.subr.mxu0 %v2315_v3 }
 0x180   : > { %1790 = vmatpush3.msra.mxu0 %v2576_v18  ;;  %v2726_v48 = vpop.f32.mrf.mxu0  ;;  %v2775_v18 = vld [vmem:[#allocation11 + $0x20] sm:$0xff] }
 0x181   : > { %1791 = vmatprep.subr.mxu0 %v2315_v3 }
 0x182   : > { %1792 = vmatpush3.msra.mxu0 %v2580_v20  ;;  %v2728_v49 = vpop.f32.mrf.mxu0  ;;  %v2783_v20 = vld [vmem:[#allocation11 + $0x10] sm:$0xff] }
 0x183   : > { %1793 = vmatprep.subr.mxu0 %v2315_v3 }
 0x184   : > { %1794 = vmatpush3.msra.mxu0 %v2584_v22  ;;  %v2791_v22 = vld [vmem:[#allocation11] sm:$0xff] }
 0x185   : > { %1795 = vmatprep.subr.mxu0 %v2315_v3 }
 0x186   : > { %1796 = vmatpush3.msra.mxu0 %v2590_v25  ;;  %v1032_v25 = vstv %s2801_s16  ;;  %s2237_s16 = sshll.u32 %s2318_s9, 4  ;;  %s2238_s16 = int_to_ptr.vmem [resolvable:$false] %s2237_s16 }
 0x187   : > { %1797 = vmatprep.subr.mxu0 %v2315_v3  ;;  %vm1033_vm1 = vcmp.lt.s32.totalorder %v1032_v25, %v2798_v23  ;;  %p2240_p3 = scmp.lt.s32.totalorder %s2943_s19, %s2238_s16 }
 0x188   : > { %1798 = vmatpush3.msra.mxu0 %v2593_v27  ;;  %v1034_v26 = vsel %vm1033_vm1, 1, %v2317_v24  ;;  %v512_v27 = vadd.f32 %v2689_v40, %v2728_v49 }
 0x189   : > { %1799 = vmatprep.subr.mxu0 %v2315_v3  ;;  %1036 = vperm.xlu0 %2083, %v1034_v26  }
 0x18a   : > { %1800 = vmatpush3.msra.mxu0 %v2597_v29 }
 0x18b   : > { %1801 = vmatprep.subr.mxu0 %v2315_v3 }
 0x18c   : > { %1802 = vmatpush3.msra.mxu0 %v2601_v31 }
 0x18d   : > { %1803 = vmatprep.subr.mxu0 %v2315_v3 }
 0x18e   : > { %1804 = vmatpush3.msra.mxu0 %v2605_v33  ;;  %v1115_v33 = vstv %s1114_s25  ;;  %s2239_s25 = scalar_lea.vmem %s2238_s16, 1024 }
 0x18f   : > { %1805 = vmatprep.subr.mxu0 %v2315_v3  ;;  %vm1116_vm2 = vcmp.lt.s32.totalorder %v1115_v33, %v2798_v23  ;;  %p2241_p12 = scmp.lt.s32.totalorder %s2239_s25, %s2233_s10 }
 0x190   : > { %1806 = vmatpush3.msra.mxu0 %v2610_v35  ;;  %v1117_v34 = vsel %vm1116_vm2, 1, %v2317_v24  ;;  %v517_v35 = vadd.f32 %v2726_v48, %v2689_v40 }
 0x191   : > { %1848 = vmatprep.subr.mxu0 %v2315_v3  ;;  %1119 = vperm.xlu0 %2083, %v1117_v34   ;;  %p2242_p7 = por %p2241_p12, %p2240_p3 }
 0x193   : > { %p2243_p6 = pnand %p2242_p7, %p2236_p0 }
 0x231   : > { %v667_v51 = vpop.f32.mrf.mxu0 }
 0x232   : > { %v671_v52 = vadd.f32 %v667_v51, %v507_v50  ;;  %v1198_v50 = vstv %s1197_s23 }
 0x233   : > { %v1739_v53 = vpop.f32.mrf.mxu0  ;;  %vm1199_vm4 = vcmp.lt.s32.totalorder %v1198_v50, %v2798_v23 }
 0x234   : > { %2087 = vtanh.f32 %v671_v52  ;;  %v1200_v51 = vsel %vm1199_vm4, 1, %v2317_v24 }
 0x235   : > { %1202 = vperm.xlu1 %2084, %v1200_v51  }
 0x241   : > { %v2088_v54 = vpop.eup %2087 }
 0x242   : > { %1773 = vmatmul.mubr.f32.vlgmr.msra.gmra.mxu1 %v2088_v54 }
 0x243   : > { %1811 = vmatpush3.msra.mxu1 %v840_v47  ;;  %1842 = vmatprep.mubr.f32.mxu1 %v2086_v46  ;;  %v1037_v47 = vpop.permute.xlu0 %1036 }
 0x244   : > { %1812 = vmatprep.subr.mxu1 %v839_v55  ;;  %vm1038_vm3 = vcmp.eq.s32.totalorder %v1037_v47, 1 }
 0x245   : > { %1813 = vmatpush3.msra.mxu1 %v839_v55 }
 0x246   : > { %1814 = vmatprep.subr.mxu1 %v838_v56 }
 0x247   : > { %1815 = vmatpush3.msra.mxu1 %v838_v56 }
 0x248   : > { %1816 = vmatprep.subr.mxu1 %v837_v57 }
 0x249   : > { %1817 = vmatpush3.msra.mxu1 %v837_v57 }
 0x24a   : > { %1818 = vmatprep.subr.mxu1 %v836_v58 }
 0x24b   : > { %1819 = vmatpush3.msra.mxu1 %v836_v58 }
 0x24c   : > { %1820 = vmatprep.subr.mxu1 %v835_v59 }
 0x24d   : > { %1821 = vmatpush3.msra.mxu1 %v835_v59 }
 0x24e   : > { %1822 = vmatprep.subr.mxu1 %v834_v60 }
 0x24f   : > { %1823 = vmatpush3.msra.mxu1 %v834_v60  ;;  %v1281_v60 = vstv %s1280_s21 }
 0x250   : > { %1824 = vmatprep.subr.mxu1 %v833_v61  ;;  %vm1282_vm6 = vcmp.lt.s32.totalorder %v1281_v60, %v2798_v23 }
 0x251   : > { %1825 = vmatpush3.msra.mxu1 %v833_v61  ;;  %v1283_v61 = vsel %vm1282_vm6, 1, %v2317_v24 }
 0x252   : > { %1826 = vmatprep.subr.mxu1 %v832_v62  ;;  %1285 = vperm.xlu1 %2084, %v1283_v61  }
 0x253   : > { %1827 = vmatpush3.msra.mxu1 %v832_v62 }
 0x254   : > { %1828 = vmatprep.subr.mxu1 %v831_v63 }
 0x255   : > { %1829 = vmatpush3.msra.mxu1 %v831_v63 }
 0x256   : > { %1830 = vmatprep.subr.mxu1 %v830_v0 }
 0x257   : > { %1831 = vmatpush3.msra.mxu1 %v830_v0 }
 0x258   : > { %1832 = vmatprep.subr.mxu1 %v829_v1 }
 0x259   : > { %1833 = vmatpush3.msra.mxu1 %v829_v1 }
 0x25a   : > { %1834 = vmatprep.subr.mxu1 %v828_v2 }
 0x25b   : > { %1835 = vmatpush3.msra.mxu1 %v828_v2 }
 0x25c   : > { %1836 = vmatprep.subr.mxu1 %v827_v4 }
 0x25d   : > { %1837 = vmatpush3.msra.mxu1 %v827_v4 }
 0x25e   : > { %1838 = vmatprep.subr.mxu1 %v826_v5 }
 0x25f   : > { %1839 = vmatpush3.msra.mxu1 %v826_v5 }
 0x260   : > { %1840 = vmatprep.subr.mxu1 %v825_v6 }
 0x261   : > { %1841 = vmatpush3.msra.mxu1 %v825_v6 }
 0x262   : > { %1843 = vmatmul.mubr.f32.vlgmr.msra.gmra.mxu1 %v2088_v54  ;;  %1883 = vmatprep.subr.mxu1 %v2315_v3 }
 0x263   : > { %1884 = vmatpush3.msra.mxu1 %v2732_v7 }
 0x264   : > { %1885 = vmatprep.subr.mxu1 %v2315_v3 }
 0x265   : > { %1886 = vmatpush3.msra.mxu1 %v2735_v8 }
 0x266   : > { %1887 = vmatprep.subr.mxu1 %v2315_v3 }
 0x267   : > { %1888 = vmatpush3.msra.mxu1 %v2739_v9 }
 0x268   : > { %1889 = vmatprep.subr.mxu1 %v2315_v3 }
 0x269   : > { %1890 = vmatpush3.msra.mxu1 %v2743_v10 }
 0x26a   : > { %1891 = vmatprep.subr.mxu1 %v2315_v3 }
 0x26b   : > { %1892 = vmatpush3.msra.mxu1 %v2747_v11 }
 0x26c   : > { %1893 = vmatprep.subr.mxu1 %v2315_v3 }
 0x26d   : > { %1894 = vmatpush3.msra.mxu1 %v2751_v12 }
 0x26e   : > { %1895 = vmatprep.subr.mxu1 %v2315_v3 }
 0x26f   : > { %1896 = vmatpush3.msra.mxu1 %v2755_v13 }
 0x270   : > { %1897 = vmatprep.subr.mxu1 %v2315_v3 }
 0x271   : > { %1898 = vmatpush3.msra.mxu1 %v2759_v14 }
 0x272   : > { %1899 = vmatprep.subr.mxu1 %v2315_v3 }
 0x273   : > { %1900 = vmatpush3.msra.mxu1 %v2763_v15 }
 0x274   : > { %1901 = vmatprep.subr.mxu1 %v2315_v3 }
 0x275   : > { %1902 = vmatpush3.msra.mxu1 %v2767_v16 }
 0x276   : > { %1903 = vmatprep.subr.mxu1 %v2315_v3 }
 0x277   : > { %1904 = vmatpush3.msra.mxu1 %v2771_v17 }
 0x278   : > { %1905 = vmatprep.subr.mxu1 %v2315_v3 }
 0x279   : > { %1906 = vmatpush3.msra.mxu1 %v2775_v18 }
 0x27a   : > { %1907 = vmatprep.subr.mxu1 %v2315_v3 }
 0x27b   : > { %1908 = vmatpush3.msra.mxu1 %v2779_v19 }
 0x27c   : > { %1909 = vmatprep.subr.mxu1 %v2315_v3 }
 0x27d   : > { %1910 = vmatpush3.msra.mxu1 %v2783_v20 }
 0x27e   : > { %1911 = vmatprep.subr.mxu1 %v2315_v3 }
 0x27f   : > { %1912 = vmatpush3.msra.mxu1 %v2787_v21 }
 0x280   : > { %1913 = vmatprep.subr.mxu1 %v2315_v3 }
 0x281   : > { %1914 = vmatpush3.msra.mxu1 %v2791_v22 }
 0x282   : > { %1953 = vmatprep.subr.mxu1 %v2315_v3 }
 0x2b0   : > { %v1203_v2 = vpop.permute.xlu1 %1202 }
 0x2b1   : > { %vm1204_vm7 = vcmp.eq.s32.totalorder %v1203_v2, 1 }
 0x302   : > { %v742_v28 = vpop.f32.mrf.mxu1 }
 0x303   : > { %v746_v29 = vadd.f32 %v742_v28, %v512_v27 }
 0x304   : > { %v1774_v30 = vpop.f32.mrf.mxu1 }
 0x305   : > { %2089 = vtanh.f32 %v746_v29 }
 0x312   : > { %v2090_v31 = vpop.eup %2089 }
 0x313   : > { %1808 = vmatmul.mubr.f32.vlgmr.msra.gmra.mxu0 %v2090_v31  ;;  %1845 = vmatprep.mubr.f32.mxu1 %v2090_v31 }
 0x314   : > { %1849 = vmatpush3.msra.mxu0 %v2732_v7  ;;  %1880 = vmatprep.mubr.msk.f32.mxu0 %vm2316_vm0, %v2315_v3 }
 0x315   : > { %1850 = vmatprep.subr.mxu0 %v2315_v3 }
 0x316   : > { %1851 = vmatpush3.msra.mxu0 %v2735_v8 }
 0x317   : > { %1852 = vmatprep.subr.mxu0 %v2315_v3 }
 0x318   : > { %1853 = vmatpush3.msra.mxu0 %v2739_v9 }
 0x319   : > { %1854 = vmatprep.subr.mxu0 %v2315_v3 }
 0x31a   : > { %1855 = vmatpush3.msra.mxu0 %v2743_v10 }
 0x31b   : > { %1856 = vmatprep.subr.mxu0 %v2315_v3 }
 0x31c   : > { %1857 = vmatpush3.msra.mxu0 %v2747_v11 }
 0x31d   : > { %1858 = vmatprep.subr.mxu0 %v2315_v3 }
 0x31e   : > { %1859 = vmatpush3.msra.mxu0 %v2751_v12 }
 0x31f   : > { %1860 = vmatprep.subr.mxu0 %v2315_v3 }
 0x320   : > { %1861 = vmatpush3.msra.mxu0 %v2755_v13 }
 0x321   : > { %1862 = vmatprep.subr.mxu0 %v2315_v3 }
 0x322   : > { %1863 = vmatpush3.msra.mxu0 %v2759_v14  ;;  %v1844_v41 = vpop.f32.mrf.mxu1 }
 0x323   : > { %1864 = vmatprep.subr.mxu0 %v2315_v3  ;;  %v940_v54 = vadd.f32 %v1844_v41, %v2888_v43 }
 0x324   : > { %1865 = vmatpush3.msra.mxu0 %v2763_v15  ;;  %v934_v42 = vpop.f32.mrf.mxu1 }
 0x325   : > { %1866 = vmatprep.subr.mxu0 %v2315_v3  ;;  %v935_v40 = vadd.f32 %v2888_v43, %v934_v42 }
 0x326   : > { %1867 = vmatpush3.msra.mxu0 %v2767_v16 }
 0x327   : > { %1868 = vmatprep.subr.mxu0 %v2315_v3 }
 0x328   : > { %1869 = vmatpush3.msra.mxu0 %v2771_v17 }
 0x329   : > { %1870 = vmatprep.subr.mxu0 %v2315_v3 }
 0x32a   : > { %1871 = vmatpush3.msra.mxu0 %v2775_v18 }
 0x32b   : > { %1872 = vmatprep.subr.mxu0 %v2315_v3 }
 0x32c   : > { %1873 = vmatpush3.msra.mxu0 %v2779_v19 }
 0x32d   : > { %1874 = vmatprep.subr.mxu0 %v2315_v3 }
 0x32e   : > { %1875 = vmatpush3.msra.mxu0 %v2783_v20 }
 0x32f   : > { %1876 = vmatprep.subr.mxu0 %v2315_v3 }
 0x330   : > { %1877 = vmatpush3.msra.mxu0 %v2787_v21 }
 0x331   : > { %1878 = vmatprep.subr.mxu0 %v2315_v3 }
 0x332   : > { %1879 = vmatpush3.msra.mxu0 %v2791_v22 }
 0x333   : > { %1881 = vmatmul.mubr.f32.vlgmr.msra.gmra.mxu0 %v958_v32  ;;  %1918 = vmatprep.subr.mxu0 %v2315_v3 }
 0x334   : > { %1919 = vmatpush3.msra.mxu0 %v2732_v7  ;;  %1950 = vmatprep.mubr.msk.f32.mxu0 %vm2316_vm0, %v2315_v3 }
 0x335   : > { %1920 = vmatprep.subr.mxu0 %v2315_v3 }
 0x336   : > { %1921 = vmatpush3.msra.mxu0 %v2735_v8 }
 0x337   : > { %1922 = vmatprep.subr.mxu0 %v2315_v3 }
 0x338   : > { %1923 = vmatpush3.msra.mxu0 %v2739_v9 }
 0x339   : > { %1924 = vmatprep.subr.mxu0 %v2315_v3 }
 0x33a   : > { %1925 = vmatpush3.msra.mxu0 %v2743_v10 }
 0x33b   : > { %1926 = vmatprep.subr.mxu0 %v2315_v3 }
 0x33c   : > { %1927 = vmatpush3.msra.mxu0 %v2747_v11 }
 0x33d   : > { %1928 = vmatprep.subr.mxu0 %v2315_v3 }
 0x33e   : > { %1929 = vmatpush3.msra.mxu0 %v2751_v12 }
 0x33f   : > { %1930 = vmatprep.subr.mxu0 %v2315_v3 }
 0x340   : > { %1931 = vmatpush3.msra.mxu0 %v2755_v13 }
 0x341   : > { %1932 = vmatprep.subr.mxu0 %v2315_v3 }
 0x342   : > { %1933 = vmatpush3.msra.mxu0 %v2759_v14 }
 0x343   : > { %1934 = vmatprep.subr.mxu0 %v2315_v3 }
 0x344   : > { %1935 = vmatpush3.msra.mxu0 %v2763_v15 }
 0x345   : > { %1936 = vmatprep.subr.mxu0 %v2315_v3 }
 0x346   : > { %1937 = vmatpush3.msra.mxu0 %v2767_v16 }
 0x347   : > { %1938 = vmatprep.subr.mxu0 %v2315_v3 }
 0x348   : > { %1939 = vmatpush3.msra.mxu0 %v2771_v17 }
 0x349   : > { %1940 = vmatprep.subr.mxu0 %v2315_v3 }
 0x34a   : > { %1941 = vmatpush3.msra.mxu0 %v2775_v18 }
 0x34b   : > { %1942 = vmatprep.subr.mxu0 %v2315_v3 }
 0x34c   : > { %1943 = vmatpush3.msra.mxu0 %v2779_v19 }
 0x34d   : > { %1944 = vmatprep.subr.mxu0 %v2315_v3 }
 0x34e   : > { %1945 = vmatpush3.msra.mxu0 %v2783_v20 }
 0x34f   : > { %1946 = vmatprep.subr.mxu0 %v2315_v3 }
 0x350   : > { %1947 = vmatpush3.msra.mxu0 %v2787_v21 }
 0x351   : > { %1948 = vmatprep.subr.mxu0 %v2315_v3 }
 0x352   : > { %1949 = vmatpush3.msra.mxu0 %v2791_v22 }
 0x3d3   : > { %v817_v36 = vpop.f32.mrf.mxu0 }
 0x3d4   : > { %v821_v37 = vadd.f32 %v817_v36, %v517_v35 }
 0x3d5   : > { %v1809_v38 = vpop.f32.mrf.mxu0 }
 0x3d6   : > { %2091 = vtanh.f32 %v821_v37 }
 0x3e3   : > { %v2092_v39 = vpop.eup %2091 }
 0x3e4   : > { %824 = vst [vmem:[#allocation2] sm:$0xff] %v2092_v39  ;;  %1846 = vmatmul.mubr.f32.gmra.mxu1 %v2092_v39 }
 0x3e5   : > { %1915 = vmatprep.mubr.msk.f32.mxu1 %vm2316_vm0, %v2315_v3 }
 0x3f3   : > { %v1026_v44 = vpop.f32.mrf.mxu0 }
 0x3f4   : > { %v1030_v45 = vadd.f32 %v1026_v44, %v935_v40 }
 0x3f5   : > { %v1882_v46 = vpop.f32.mrf.mxu0 }
 0x3f6   : > { %2093 = vtanh.f32 %v1030_v45 }
 0x403   : > { %v2094_v48 = vpop.eup %2093 }
 0x404   : > { %v1039_v49 = vsel %vm1038_vm3, %v2094_v48, -7.0  ;;  %1916 = vmatmul.mubr.f32.vlgmr.msra.gmra.mxu1 %v2094_v48 }
 0x405   : > { %1040 = vst [vmem:[%s2543_s13] sm:$0xff] %v1039_v49  ;;  %1954 = vmatpush3.msra.mxu1 %v2732_v7  ;;  %1985 = vmatprep.mubr.msk.f32.mxu1 %vm2316_vm0, %v2315_v3 }
 0x406   : > { %1955 = vmatprep.subr.mxu1 %v2315_v3 }
 0x407   : > { %1956 = vmatpush3.msra.mxu1 %v2735_v8 }
 0x408   : > { %1957 = vmatprep.subr.mxu1 %v2315_v3 }
 0x409   : > { %1958 = vmatpush3.msra.mxu1 %v2739_v9 }
 0x40a   : > { %1959 = vmatprep.subr.mxu1 %v2315_v3 }
 0x40b   : > { %1960 = vmatpush3.msra.mxu1 %v2743_v10  ;;  %v1286_v10 = vpop.permute.xlu1 %1285 }
 0x40c   : > { %1961 = vmatprep.subr.mxu1 %v2315_v3  ;;  %vm1287_vm8 = vcmp.eq.s32.totalorder %v1286_v10, 1 }
 0x40d   : > { %1962 = vmatpush3.msra.mxu1 %v2747_v11 }
 0x40e   : > { %1963 = vmatprep.subr.mxu1 %v2315_v3 }
 0x40f   : > { %1964 = vmatpush3.msra.mxu1 %v2751_v12 }
 0x410   : > { %1965 = vmatprep.subr.mxu1 %v2315_v3 }
 0x411   : > { %1966 = vmatpush3.msra.mxu1 %v2755_v13 }
 0x412   : > { %1967 = vmatprep.subr.mxu1 %v2315_v3 }
 0x413   : > { %1968 = vmatpush3.msra.mxu1 %v2759_v14 }
 0x414   : > { %1969 = vmatprep.subr.mxu1 %v2315_v3 }
 0x415   : > { %1970 = vmatpush3.msra.mxu1 %v2763_v15 }
 0x416   : > { %1971 = vmatprep.subr.mxu1 %v2315_v3 }
 0x417   : > { %1972 = vmatpush3.msra.mxu1 %v2767_v16 }
 0x418   : > { %1973 = vmatprep.subr.mxu1 %v2315_v3 }
 0x419   : > { %1974 = vmatpush3.msra.mxu1 %v2771_v17 }
 0x41a   : > { %1975 = vmatprep.subr.mxu1 %v2315_v3 }
 0x41b   : > { %1976 = vmatpush3.msra.mxu1 %v2775_v18 }
 0x41c   : > { %1977 = vmatprep.subr.mxu1 %v2315_v3 }
 0x41d   : > { %1978 = vmatpush3.msra.mxu1 %v2779_v19 }
 0x41e   : > { %1979 = vmatprep.subr.mxu1 %v2315_v3 }
 0x41f   : > { %1980 = vmatpush3.msra.mxu1 %v2783_v20 }
 0x420   : > { %1981 = vmatprep.subr.mxu1 %v2315_v3 }
 0x421   : > { %1982 = vmatpush3.msra.mxu1 %v2787_v21 }
 0x422   : > { %1983 = vmatprep.subr.mxu1 %v2315_v3  ;;  %v1120_v3 = vpop.permute.xlu0 %1119 }
 0x423   : > { %1984 = vmatpush3.msra.mxu1 %v2791_v22  ;;  %vm1121_vm5 = vcmp.eq.s32.totalorder %v1120_v3, 1 }
 0x4a4   : > { %v1847_v52 = vpop.f32.mrf.mxu1 }
 0x4a5   : > { %v950_v6 = vadd.f32 %v1847_v52, %v2888_v43 }
 0x4a6   : > { %v944_v53 = vpop.f32.mrf.mxu1 }
 0x4a7   : > { %v945_v62 = vadd.f32 %v2888_v43, %v944_v53 }
 0x4c4   : > { %v1108_v55 = vpop.f32.mrf.mxu1 }
 0x4c5   : > { %v1112_v56 = vadd.f32 %v1108_v55, %v940_v54 }
 0x4c6   : > { %v1917_v57 = vpop.f32.mrf.mxu1 }
 0x4c7   : > { %2095 = vtanh.f32 %v1112_v56 }
 0x4d4   : > { %v2096_v58 = vpop.eup %2095 }
 0x4d5   : > { %v1122_v59 = vsel %vm1121_vm5, %v2096_v58, -7.0  ;;  %1951 = vmatmul.mubr.f32.vlgmr.msra.gmra.mxu0 %v2096_v58 }
 0x4d6   : > { %1444 = vst [vmem:[%s2543_s13 + $0x8] sm:$0xff] %v1122_v59 }
 0x595   : > { %v1191_v63 = vpop.f32.mrf.mxu0 }
 0x596   : > { %v1195_v0 = vadd.f32 %v1191_v63, %v945_v62 }
 0x597   : > { %v1952_v1 = vpop.f32.mrf.mxu0 }
 0x598   : > { %2097 = vtanh.f32 %v1195_v0 }
 0x5a5   : > { %v2098_v4 = vpop.eup %2097 }
 0x5a6   : > { %v1205_v5 = vsel %vm1204_vm7, %v2098_v4, -7.0  ;;  %1986 = vmatmul.mubr.f32.vlgmr.msra.gmra.mxu1 %v2098_v4 }
 0x5a7   : > { %1446 = vst [vmem:[%s2543_s13 + $0x10] sm:$0xff] %v1205_v5 }
 0x666   : > { %v1274_v7 = vpop.f32.mrf.mxu1 }
 0x667   : > { %v1278_v8 = vadd.f32 %v1274_v7, %v950_v6 }
 0x668   : > { %v1987_v9 = vpop.f32.mrf.mxu1 }
 0x669   : > { %2099 = vtanh.f32 %v1278_v8 }
 0x676   : > { %v2100_v11 = vpop.eup %2099 }
 0x677   : > { %1290 = vst [vmem:[#allocation2 + $0x8] sm:$0xff] %v2100_v11  ;;  %v1288_v12 = vsel %vm1287_vm8, %v2100_v11, -7.0 }
 0x678   : > { %1448 = vst [vmem:[%s2543_s13 + $0x18] sm:$0xff] %v1288_v12 }
 0x679   : > { %2246 = shalt.err (!%p2243_p6)
}
 0x67a   : > { %s2247_s13 = scalar_lea.hbm %s2941_s22, 512  ;;  %s2251_s23 = scalar_lea.hbm %s2995_s8, 1024 }
 0x67b   : > { %p2248_p4 = scmp.ne.s32.totalorder %s2941_s22, %s2247_s13  ;;  %p2252_p2 = scmp.lt.s32.totalorder %s2941_s22, %s2995_s8 }
 0x67c   : > { %p2253_p11 = scmp.lt.s32.totalorder %s2251_s23, %s2247_s13 }
 0x67d   : > { %p2249_p9 = pnand %p2248_p4, %p3021_p5 }
 0x67e   : > { %p2254_p8 = por %p2253_p11, %p2252_p2 }
 0x67f   : > { %p2250_p10 = pneg %p2249_p9 }
 0x681   : > { %p2255_p13 = pnand %p2254_p8, %p2250_p10 }
 0x683   : > { %2258 = shalt.err (!%p2255_p13)
}
 0x684   : > { %s2319_s24 = smov 128   ;;  %s2320_s11 = smov 8  }
 0x685   : > { %2006 = dma.vmem_to_hbm [thread:$0]  (%p3021_p5), %s2943_s19, 512, %s2941_s22, %s1292_s20, %s2319_s24, %s2319_s24, %s2320_s11  }
 0x686 PF: > { %s1320_s10 = sand.u32 1, %s2293_s27   ;;  %p3022_p1 = scmp.ne.s32.totalorder %s3005_s12, 0 }
 0x687   : > { %p3023_p0 = scmp.ge.s32.totalorder %s2305_s30, 2  ;;  %s1321_s9 = scalar_lea.sflag [#allocation5], %s1320_s10 }
 0x689   : > { %p2026_p3 = pnand %p3023_p0, %p3022_p1 }
 0x68b   : > { %p2027_p12 = pneg %p2026_p3 }
 0x68d   : > { %2288 = dma.done.wait (%p2027_p12), %s1321_s9, 512  }
 0x68e   : > { %2290 = vsyncadd (%p2027_p12), %s1321_s9, 4294966784  ;;  %p23_p7 = scmp.ge.s32.totalorder %s2467_s26, 4   ;;  %s3024_s27 = smov %s2297_s28 }
 0x68f   : > { %s3025_s28 = smov %s2301_s29  ;;  %s3026_s29 = smov %s2483_s15 }
 0x690   : > { %s3027_s30 = smov %s2467_s26  ;;  %25 = sbr.rel (!%p23_p7) target bundleno = 10 (0xa), region = 121 }
 0x695   :  { %1326 = vsyncpa [#allocation4], 1 }
 0x696   :  { %1328 = vsyncpa [#allocation4 + $0x1], 1 }
 0x697   :  { %1329 = vsyncpa [#allocation7], 1 }
 0x698   :  { %1330 = vsyncpa [#allocation10], 1 }
 0x699   :  { %1331 = vsyncpa [#allocation5], 1 }
 0x69a   :  { %1333 = vsyncpa [#allocation5 + $0x1], 1 }

</bundles_post_ra>
